<compile_context>
chip_gen: v5e
topology: v5e:2x2
jax: 0.10.0
libtpu: 0.0.40
codegen_flags: <defaults>
</compile_context>

<pallas_src>
import math

import jax
import jax.numpy as jnp
from jax import lax
from jax.experimental import pallas as pl
from jax.experimental.pallas import tpu as pltpu

# Small, module-consistent shapes.
V = 64            # vocab_size
D = 32            # d_model
H = 4             # n_heads
DK = D // H       # d_k
F = 64            # d_ff
L = 2             # n_layers_transformer
B = 2             # batch
S = 8             # seq_len
MAX_LEN = 16      # positional-encoding table length
VPAD = 128        # lane-dense logits width (>= V, multiple of 128)
WQKV = 2 * DK + D  # 48 lanes per head: [q | k | Wv@Wo-folded v]
NEG = -1e9


# ----------------------------------------------------------------------------
# Kernel
# ----------------------------------------------------------------------------
def _layer_norm(x, g, b):
    """LayerNorm over the last dim (PyTorch semantics, eps=1e-5)."""
    mu = jnp.mean(x, axis=-1, keepdims=True)
    xc = x - mu
    var = jnp.mean(xc * xc, axis=-1, keepdims=True)
    return xc * lax.rsqrt(var + 1e-5) * g + b


def _make_kernel(nb):
    """Build a kernel that processes `nb` batch elements per grid step."""
    R = nb * S        # activation rows per step (batch folded into sublanes)
    HB = H * nb       # fused heads x batch contraction-batch dim

    def kernel(ids_ref, emb_ref, pe_ref, wqkv_ref, lvec_ref, w1_ref, w2_ref,
               fvec_ref, wout_ref, logits_ref, attn_ref):
        # Shared iotas: causal mask predicate and one-hot vocab comparison.
        rows = lax.broadcasted_iota(jnp.int32, (HB, S, S), 1)
        cols = lax.broadcasted_iota(jnp.int32, (HB, S, S), 2)
        causal = rows >= cols
        vocab_iota = lax.broadcasted_iota(jnp.int32, (R, V), 1)

        # --- embedding (one-hot matmul; table pre-scaled by sqrt(D)) + PE ---
        ids = ids_ref[...]                                   # (R, 1) int32
        onehot = jnp.where(ids == vocab_iota, 1.0, 0.0)      # (R, V) f32
        x = jnp.dot(onehot, emb_ref[...],
                    preferred_element_type=jnp.float32) + pe_ref[...]   # (R, D)

        for l in range(L):                                   # static (L == 2)
            lv = lvec_ref[l]                                 # (8, F) packed vectors
            bo = lv[0:1, 0:D]
            ln1g, ln1b = lv[1:2, 0:D], lv[2:3, 0:D]
            b1 = lv[3:4, :]
            b2 = lv[4:5, 0:D]
            ln2g, ln2b = lv[5:6, 0:D], lv[6:7, 0:D]

            # ----- multi-head self-attention (batch folded, QKV+W_O fused) -----
            xb = jnp.broadcast_to(x, (H, R, D))
            qkv = lax.dot_general(                           # 4 MXU pushes / layer
                xb, wqkv_ref[l], (((2,), (1,)), ((0,), (0,))),
                preferred_element_type=jnp.float32)          # (H, R, 48)
            qkv = qkv.reshape(HB, S, WQKV)                   # leading (h, b): free
            q = qkv[:, :, 0:DK]                              # 1/sqrt(d_k) pre-folded
            k = qkv[:, :, DK:2 * DK]
            vf = qkv[:, :, 2 * DK:]                          # W_O pre-folded: (HB,S,D)

            scores = lax.dot_general(                        # contract trailing dims
                q, k, (((2,), (2,)), ((0,), (0,))),
                preferred_element_type=jnp.float32)          # (HB, S, S)
            scores = jnp.where(causal, scores, NEG)

            m = jnp.max(scores, axis=-1, keepdims=True)
            e = jnp.exp(scores - m)
            attn = e * pl.reciprocal(jnp.sum(e, axis=-1, keepdims=True),
                                     approx=False)           # (HB, S, S)
            attn_ref[l] = attn.reshape(H, nb, S, S)          # natural layout store

            ctx = lax.dot_general(                           # already W_O-projected
                attn, vf, (((2,), (1,)), ((0,), (0,))),
                preferred_element_type=jnp.float32)          # (HB, S, D)
            ctx = ctx.reshape(H, R, D)                       # (h) x (b*s rows): free
            attn_out = ctx[0]
            for h in range(1, H):                            # cheap VPU adds
                attn_out = attn_out + ctx[h]
            attn_out = attn_out + bo                         # (R, D)

            x = _layer_norm(x + attn_out, ln1g, ln1b)

            # ----- feed-forward -----
            h1 = jnp.dot(x, w1_ref[l],
                         preferred_element_type=jnp.float32) + b1
            h1 = jnp.maximum(h1, 0.0)
            ff = jnp.dot(h1, w2_ref[l],
                         preferred_element_type=jnp.float32) + b2
            x = _layer_norm(x + ff, ln2g, ln2b)

        # --- final norm + lane-dense (zero-padded) vocab projection ---
        fv = fvec_ref[...]                                   # (8, VPAD)
        x = _layer_norm(x, fv[0:1, 0:D], fv[1:2, 0:D])
        logits = jnp.dot(x, wout_ref[...],
                         preferred_element_type=jnp.float32) + fv[2:3, :]  # (R, VPAD)
        logits_ref[...] = logits.reshape(nb, S, VPAD)

    return kernel


# ----------------------------------------------------------------------------
# pallas_call wrapper
# ----------------------------------------------------------------------------
def _const_index_map(ndim):
    zeros = (0,) * ndim

    def index_map(b):
        return zeros

    return index_map


def _const_spec(shape):
    """Whole-array block, grid-invariant (weights)."""
    return pl.BlockSpec(shape, _const_index_map(len(shape)))


def build_forward(batch_per_step):
    nb = batch_per_step
    grid_b = B // nb
    R = nb * S
    kernel = _make_kernel(nb)

    grid_spec = pltpu.PrefetchScalarGridSpec(
        num_scalar_prefetch=0,
        grid=(grid_b,),
        in_specs=[
            pl.BlockSpec((R, 1), lambda i: (i, 0)),          # input ids, flat (B*S, 1)
            _const_spec((V, D)),                             # embedding * sqrt(D)
            pl.BlockSpec((R, D), lambda i: (i, 0)),          # PE tiled to (B*S, D)
            _const_spec((L, H, D, WQKV)),                    # fused [q | k | Wv@Wo]
            _const_spec((L, 8, F)),                          # packed per-layer vectors
            _const_spec((L, D, F)),                          # ffn w1
            _const_spec((L, F, D)),                          # ffn w2
            _const_spec((8, VPAD)),                          # packed final ln + bias
            _const_spec((D, VPAD)),                          # output proj (lane-padded)
        ],
        out_specs=[
            pl.BlockSpec((nb, S, VPAD), lambda i: (i, 0, 0)),           # logits (padded)
            pl.BlockSpec((L, H, nb, S, S), lambda i: (0, 0, i, 0, 0)),  # attention weights
        ],
    )

    call = pl.pallas_call(
        kernel,
        out_shape=(
            jax.ShapeDtypeStruct((B, S, VPAD), jnp.float32),
            jax.ShapeDtypeStruct((L, H, B, S, S), jnp.float32),
        ),
        grid_spec=grid_spec,
        compiler_params=pltpu.CompilerParams(
            dimension_semantics=("parallel",)),
    )

    @jax.jit
    def forward(ids, kparams):
        ids2 = ids.reshape(B * S, 1).astype(jnp.int32)
        logits_pad, attn = call(ids2, *kparams)
        logits = logits_pad[:, :, :V]                        # drop lane padding
        attn = jnp.transpose(attn, (2, 0, 1, 3, 4))          # (B, L, H, S, S)
        return logits, attn

    return forward


# ----------------------------------------------------------------------------
# Parameter construction / host-side prep
# ----------------------------------------------------------------------------
def sinusoidal_pe(max_len, d_model):
    pos = jnp.arange(max_len, dtype=jnp.float32)[:, None]
    div = jnp.exp(jnp.arange(0, d_model, 2, dtype=jnp.float32)
                  * (-math.log(10000.0) / d_model))
    pe = jnp.zeros((max_len, d_model), jnp.float32)
    pe = pe.at[:, 0::2].set(jnp.sin(pos * div))
    pe = pe.at[:, 1::2].set(jnp.cos(pos * div))
    return pe


def init_raw_params(key):
    ks = iter(jax.random.split(key, 64))

    def nrm(shape, scale):
        return scale * jax.random.normal(next(ks), shape, jnp.float32)

    layers = []
    for _ in range(L):
        layers.append(dict(
            wq=nrm((D, D), 0.2), wk=nrm((D, D), 0.2), wv=nrm((D, D), 0.2),
            wo=nrm((D, D), 0.2), bo=nrm((D,), 0.1),
            ln1g=1.0 + nrm((D,), 0.1), ln1b=nrm((D,), 0.1),
            w1=nrm((D, F), 0.2), b1=nrm((F,), 0.1),
            w2=nrm((F, D), 0.2), b2=nrm((D,), 0.1),
            ln2g=1.0 + nrm((D,), 0.1), ln2b=nrm((D,), 0.1),
        ))
    return dict(
        emb=nrm((V, D), 0.3),
        lnfg=1.0 + nrm((D,), 0.1), lnfb=nrm((D,), 0.1),
        wout=nrm((D, V), 0.2), bout=nrm((V,), 0.1),
        layers=layers,
    )


def prep_kernel_params(raw, pe):
    """One-time host-side weight prep: head split, QKV+W_O fusion, scale folding,
    lane-dense output padding and small-vector packing."""
    inv_scale = 1.0 / math.sqrt(DK)

    def heads_in(w):   # (D, D) -> (H, D, DK): per-head column blocks
        return jnp.transpose(w.reshape(D, H, DK), (1, 0, 2))

    def pad_row(v, width):
        return jnp.pad(v, (0, width - v.shape[0]))

    wqkv_layers, lvec_layers = [], []
    for p in raw["layers"]:
        q = heads_in(p["wq"]) * inv_scale                       # fold 1/sqrt(d_k) into Q
        k = heads_in(p["wk"])
        vo = jnp.einsum("hdk,hkm->hdm", heads_in(p["wv"]),
                        p["wo"].reshape(H, DK, D))              # fold W_O into W_V
        wqkv_layers.append(jnp.concatenate([q, k, vo], axis=-1))   # (H, D, 48)
        lvec_layers.append(jnp.stack([
            pad_row(p["bo"], F), pad_row(p["ln1g"], F), pad_row(p["ln1b"], F),
            p["b1"],
            pad_row(p["b2"], F), pad_row(p["ln2g"], F), pad_row(p["ln2b"], F),
            jnp.zeros((F,), jnp.float32)]))                     # (8, F)

    fvec = jnp.stack(
        [pad_row(raw["lnfg"], VPAD), pad_row(raw["lnfb"], VPAD),
         pad_row(raw["bout"], VPAD)]
        + [jnp.zeros((VPAD,), jnp.float32)] * 5)                # (8, VPAD)

    return (
        raw["emb"] * math.sqrt(D),                              # embedding * sqrt(d_model)
        jnp.tile(pe[:S], (B, 1)),                               # PE tiled to (B*S, D)
        jnp.stack(wqkv_layers),                                 # (L, H, D, 48)
        jnp.stack(lvec_layers),                                 # (L, 8, F)
        jnp.stack([p["w1"] for p in raw["layers"]]),            # (L, D, F)
        jnp.stack([p["w2"] for p in raw["layers"]]),            # (L, F, D)
        fvec,                                                   # (8, VPAD)
        jnp.pad(raw["wout"], ((0, 0), (0, VPAD - V))),          # (D, VPAD) lane-dense
    )


# ----------------------------------------------------------------------------
# Pure-JAX reference (matches the PyTorch forward in eval mode, causal mask)
# ----------------------------------------------------------------------------
def _layer_norm_ref(x, g, b, eps=1e-5):
    mu = x.mean(axis=-1, keepdims=True)
    var = ((x - mu) ** 2).mean(axis=-1, keepdims=True)
    return (x - mu) / jnp.sqrt(var + eps) * g + b


def reference_forward(ids, raw, pe):
    x = raw["emb"][ids] * math.sqrt(D) + pe[None, :S]
    mask = jnp.tril(jnp.ones((S, S), dtype=bool))[None, None]
    attn_all = []
    for p in raw["layers"]:
        def split(z):
            return z.reshape(B, S, H, DK).transpose(0, 2, 1, 3)
        q, k, v = split(x @ p["wq"]), split(x @ p["wk"]), split(x @ p["wv"])
        scores = jnp.einsum("bhqd,bhkd->bhqk", q, k) / math.sqrt(DK)
        scores = jnp.where(mask, scores, -1e9)
        attn = jax.nn.softmax(scores, axis=-1)
        attn_all.append(attn)
        ctx = jnp.einsum("bhqk,bhkd->bhqd", attn, v)
        ctx = ctx.transpose(0, 2, 1, 3).reshape(B, S, D)
        x = _layer_norm_ref(x + ctx @ p["wo"] + p["bo"], p["ln1g"], p["ln1b"])
        ff = jnp.maximum(x @ p["w1"] + p["b1"], 0.0) @ p["w2"] + p["b2"]
        x = _layer_norm_ref(x + ff, p["ln2g"], p["ln2b"])
    x = _layer_norm_ref(x, raw["lnfg"], raw["lnfb"])
    logits = x @ raw["wout"] + raw["bout"]
    return logits, jnp.stack(attn_all, axis=1)        # (B, L, H, S, S)


# ----------------------------------------------------------------------------
# Device-aware grid choice
# ----------------------------------------------------------------------------
def _num_tensorcores():
    """TensorCores per chip; any wrong answer only costs perf, never correctness."""
    info = None
    try:
        info = pltpu.get_tpu_info()
    except Exception:
        info = None
    if info is not None:
        for attr in ("num_tensorcores", "tensorcores_per_chip", "num_cores",
                     "cores_per_chip", "core_count"):
            try:
                n = int(getattr(info, attr))
                if n > 0:
                    return n
            except Exception:
                continue
    try:
        kind = jax.devices()[0].device_kind.lower()
        if any(tag in kind for tag in ("v7", "v4", "v5p")):
            return 2
    except Exception:
        pass
    return 1


def _batch_per_step():
    cores = _num_tensorcores()
    if cores <= 1:
        return B                       # single-TC v5e/v6e: one step, batch folded in
    return max(1, B // min(cores, B))  # multi-TC: one batch element per core


# ----------------------------------------------------------------------------
# Main
# ----------------------------------------------------------------------------
if __name__ == "__main__":
    key0 = jax.random.PRNGKey(0)
    kparam, kids = jax.random.split(key0)

    raw = init_raw_params(kparam)
    pe = sinusoidal_pe(MAX_LEN, D)
    ids = jax.random.randint(kids, (B, S), 0, V, dtype=jnp.int32)

    kernel_params = prep_kernel_params(raw, pe)
    forward = build_forward(_batch_per_step())

    logits, attn = forward(ids, kernel_params)
    jax.block_until_ready((logits, attn))

    ref_logits, ref_attn = reference_forward(ids, raw, pe)
    assert logits.shape == (B, S, V) and attn.shape == (B, L, H, S, S)
    assert jnp.allclose(logits, ref_logits, atol=1e-4, rtol=1e-4), \
        float(jnp.max(jnp.abs(logits - ref_logits)))
    assert jnp.allclose(attn, ref_attn, atol=1e-4, rtol=1e-4), \
        float(jnp.max(jnp.abs(attn - ref_attn)))

    print("KERNEL_OK")
</pallas_src>

<mosaic_0001>
module attributes {stable_mosaic.version = 11 : i64} {
  func.func @kernel(%arg0: i32, %arg1: memref<16x1xi32, #tpu.memory_space<vmem>>, %arg2: memref<64x32xf32, #tpu.memory_space<vmem>>, %arg3: memref<16x32xf32, #tpu.memory_space<vmem>>, %arg4: memref<2x4x32x48xf32, #tpu.memory_space<vmem>>, %arg5: memref<2x8x64xf32, #tpu.memory_space<vmem>>, %arg6: memref<2x32x64xf32, #tpu.memory_space<vmem>>, %arg7: memref<2x64x32xf32, #tpu.memory_space<vmem>>, %arg8: memref<8x128xf32, #tpu.memory_space<vmem>>, %arg9: memref<32x128xf32, #tpu.memory_space<vmem>>, %arg10: memref<2x8x128xf32, #tpu.memory_space<vmem>>, %arg11: memref<2x4x2x8x8xf32, #tpu.memory_space<vmem>>) attributes {dimension_semantics = [#tpu.dimension_semantics<parallel>], iteration_bounds = array<i64: 1>, scalar_prefetch = 0 : i64, scratch_operands = 0 : i64, tpu.core_type = #tpu.core_type<tc>, window_params = [{transform_indices = @transform_0, window_bounds = array<i64: 16, 1>}, {pipeline_mode = #tpu.pipeline_mode<synchronous>, transform_indices = @transform_1, window_bounds = array<i64: 64, 32>}, {transform_indices = @transform_2, window_bounds = array<i64: 16, 32>}, {pipeline_mode = #tpu.pipeline_mode<synchronous>, transform_indices = @transform_3, window_bounds = array<i64: 2, 4, 32, 48>}, {pipeline_mode = #tpu.pipeline_mode<synchronous>, transform_indices = @transform_4, window_bounds = array<i64: 2, 8, 64>}, {pipeline_mode = #tpu.pipeline_mode<synchronous>, transform_indices = @transform_5, window_bounds = array<i64: 2, 32, 64>}, {pipeline_mode = #tpu.pipeline_mode<synchronous>, transform_indices = @transform_6, window_bounds = array<i64: 2, 64, 32>}, {pipeline_mode = #tpu.pipeline_mode<synchronous>, transform_indices = @transform_7, window_bounds = array<i64: 8, 128>}, {pipeline_mode = #tpu.pipeline_mode<synchronous>, transform_indices = @transform_8, window_bounds = array<i64: 32, 128>}, {transform_indices = @transform_9, window_bounds = array<i64: 2, 8, 128>}, {transform_indices = @transform_10, window_bounds = array<i64: 2, 4, 2, 8, 8>}]} {
    %0 = tpu.iota {dimensions = array<i32: 1>} : vector<8x8x8xi32>
    %1 = tpu.iota {dimensions = array<i32: 2>} : vector<8x8x8xi32>
    %2 = arith.cmpi sge, %0, %1 : vector<8x8x8xi32>
    %3 = tpu.iota {dimensions = array<i32: 1>} : vector<16x64xi32>
    %c0 = arith.constant 0 : index
    %c0_0 = arith.constant 0 : index
    %4 = vector.load %arg1[%c0, %c0_0] : memref<16x1xi32, #tpu.memory_space<vmem>>, vector<16x1xi32>
    %5 = vector.broadcast %4 : vector<16x1xi32> to vector<16x64xi32>
    %6 = arith.cmpi eq, %5, %3 : vector<16x64xi32>
    %cst = arith.constant 1.000000e+00 : f32
    %cst_1 = arith.constant 0.000000e+00 : f32
    %7 = vector.broadcast %cst : f32 to vector<16x64xf32>
    %8 = vector.broadcast %cst_1 : f32 to vector<16x64xf32>
    %9 = arith.select %6, %7, %8 : vector<16x64xi1>, vector<16x64xf32>
    %c0_2 = arith.constant 0 : index
    %c0_3 = arith.constant 0 : index
    %10 = vector.load %arg2[%c0_2, %c0_3] : memref<64x32xf32, #tpu.memory_space<vmem>>, vector<64x32xf32>
    %cst_4 = arith.constant dense<0.000000e+00> : vector<16x32xf32>
    %11 = tpu.matmul %9, %10, %cst_4 {dimension_numbers = #tpu.dot_dimension_numbers<[1], [0], [0], [1], [0, 0, 1, 1], [], []>} : vector<16x64xf32>, vector<64x32xf32>, vector<16x32xf32> -> vector<16x32xf32>
    %c0_5 = arith.constant 0 : index
    %c0_6 = arith.constant 0 : index
    %12 = vector.load %arg3[%c0_5, %c0_6] : memref<16x32xf32, #tpu.memory_space<vmem>>, vector<16x32xf32>
    %13 = arith.addf %11, %12 : vector<16x32xf32>
    %c0_7 = arith.constant 0 : index
    %c0_8 = arith.constant 0 : index
    %c0_9 = arith.constant 0 : index
    %14 = vector.load %arg5[%c0_7, %c0_8, %c0_9] : memref<2x8x64xf32, #tpu.memory_space<vmem>>, vector<1x8x64xf32>
    %15 = vector.shape_cast %14 : vector<1x8x64xf32> to vector<8x64xf32>
    %16 = vector.extract_strided_slice %15 {offsets = [0, 0], sizes = [1, 32], strides = [1, 1]} : vector<8x64xf32> to vector<1x32xf32>
    %17 = vector.extract_strided_slice %15 {offsets = [1, 0], sizes = [1, 32], strides = [1, 1]} : vector<8x64xf32> to vector<1x32xf32>
    %18 = vector.extract_strided_slice %15 {offsets = [2, 0], sizes = [1, 32], strides = [1, 1]} : vector<8x64xf32> to vector<1x32xf32>
    %19 = vector.extract_strided_slice %15 {offsets = [3, 0], sizes = [1, 64], strides = [1, 1]} : vector<8x64xf32> to vector<1x64xf32>
    %20 = vector.extract_strided_slice %15 {offsets = [4, 0], sizes = [1, 32], strides = [1, 1]} : vector<8x64xf32> to vector<1x32xf32>
    %21 = vector.extract_strided_slice %15 {offsets = [5, 0], sizes = [1, 32], strides = [1, 1]} : vector<8x64xf32> to vector<1x32xf32>
    %22 = vector.extract_strided_slice %15 {offsets = [6, 0], sizes = [1, 32], strides = [1, 1]} : vector<8x64xf32> to vector<1x32xf32>
    %23 = vector.shape_cast %13 : vector<16x32xf32> to vector<1x16x32xf32>
    %24 = vector.broadcast %23 : vector<1x16x32xf32> to vector<4x16x32xf32>
    %c0_10 = arith.constant 0 : index
    %c0_11 = arith.constant 0 : index
    %c0_12 = arith.constant 0 : index
    %c0_13 = arith.constant 0 : index
    %25 = vector.load %arg4[%c0_10, %c0_11, %c0_12, %c0_13] : memref<2x4x32x48xf32, #tpu.memory_space<vmem>>, vector<1x4x32x48xf32>
    %26 = vector.shape_cast %25 : vector<1x4x32x48xf32> to vector<4x32x48xf32>
    %cst_14 = arith.constant dense<0.000000e+00> : vector<4x16x48xf32>
    %27 = tpu.matmul %24, %26, %cst_14 {dimension_numbers = #tpu.dot_dimension_numbers<[2], [1], [1], [2], [0, 0, 0, 1, 1, 2], [0], [0]>} : vector<4x16x32xf32>, vector<4x32x48xf32>, vector<4x16x48xf32> -> vector<4x16x48xf32>
    %28 = vector.shape_cast %27 : vector<4x16x48xf32> to vector<8x8x48xf32>
    %29 = vector.extract_strided_slice %28 {offsets = [0, 0, 0], sizes = [8, 8, 8], strides = [1, 1, 1]} : vector<8x8x48xf32> to vector<8x8x8xf32>
    %30 = vector.extract_strided_slice %28 {offsets = [0, 0, 8], sizes = [8, 8, 8], strides = [1, 1, 1]} : vector<8x8x48xf32> to vector<8x8x8xf32>
    %31 = vector.extract_strided_slice %28 {offsets = [0, 0, 16], sizes = [8, 8, 32], strides = [1, 1, 1]} : vector<8x8x48xf32> to vector<8x8x32xf32>
    %cst_15 = arith.constant dense<0.000000e+00> : vector<8x8x8xf32>
    %32 = tpu.matmul %29, %30, %cst_15 {dimension_numbers = #tpu.dot_dimension_numbers<[2], [2], [1], [1], [0, 0, 0, 1, 1, 1], [0], [0]>} : vector<8x8x8xf32>, vector<8x8x8xf32>, vector<8x8x8xf32> -> vector<8x8x8xf32>
    %cst_16 = arith.constant -1.000000e+09 : f32
    %33 = vector.broadcast %cst_16 : f32 to vector<8x8x8xf32>
    %34 = arith.select %2, %32, %33 : vector<8x8x8xi1>, vector<8x8x8xf32>
    %cst_17 = arith.constant dense<0xFF800000> : vector<8x8xf32>
    %35 = vector.multi_reduction <maximumf>, %34, %cst_17 [2] : vector<8x8x8xf32> to vector<8x8xf32>
    %36 = vector.shape_cast %35 : vector<8x8xf32> to vector<8x8x1xf32>
    %37 = vector.broadcast %36 : vector<8x8x1xf32> to vector<8x8x8xf32>
    %38 = arith.subf %34, %37 : vector<8x8x8xf32>
    %39 = math.exp %38 : vector<8x8x8xf32>
    %cst_18 = arith.constant dense<0.000000e+00> : vector<8x8xf32>
    %40 = vector.multi_reduction <add>, %39, %cst_18 [2] : vector<8x8x8xf32> to vector<8x8xf32>
    %41 = vector.shape_cast %40 : vector<8x8xf32> to vector<8x8x1xf32>
    %42 = tpu.reciprocal %41 : vector<8x8x1xf32> -> vector<8x8x1xf32>
    %43 = vector.broadcast %42 : vector<8x8x1xf32> to vector<8x8x8xf32>
    %44 = arith.mulf %39, %43 : vector<8x8x8xf32>
    %45 = vector.shape_cast %44 : vector<8x8x8xf32> to vector<4x2x8x8xf32>
    %c0_19 = arith.constant 0 : index
    %c0_20 = arith.constant 0 : index
    %c0_21 = arith.constant 0 : index
    %c0_22 = arith.constant 0 : index
    %c0_23 = arith.constant 0 : index
    %46 = vector.load %arg11[%c0_19, %c0_20, %c0_21, %c0_22, %c0_23] : memref<2x4x2x8x8xf32, #tpu.memory_space<vmem>>, vector<1x4x2x8x8xf32>
    %47 = vector.shape_cast %46 : vector<1x4x2x8x8xf32> to vector<4x2x8x8xf32>
    %48 = vector.shape_cast %45 : vector<4x2x8x8xf32> to vector<1x4x2x8x8xf32>
    tpu.vector_store %arg11[%c0_19, %c0_20, %c0_21, %c0_22, %c0_23], %48 {strides = array<i32>} : memref<2x4x2x8x8xf32, #tpu.memory_space<vmem>>, vector<1x4x2x8x8xf32>,
    %cst_24 = arith.constant dense<0.000000e+00> : vector<8x8x32xf32>
    %49 = tpu.matmul %44, %31, %cst_24 {dimension_numbers = #tpu.dot_dimension_numbers<[2], [1], [1], [2], [0, 0, 0, 1, 1, 2], [0], [0]>} : vector<8x8x8xf32>, vector<8x8x32xf32>, vector<8x8x32xf32> -> vector<8x8x32xf32>
    %50 = vector.shape_cast %49 : vector<8x8x32xf32> to vector<4x16x32xf32>
    %51 = vector.extract_strided_slice %50 {offsets = [0, 0, 0], sizes = [1, 16, 32], strides = [1, 1, 1]} : vector<4x16x32xf32> to vector<1x16x32xf32>
    %52 = vector.shape_cast %51 : vector<1x16x32xf32> to vector<16x32xf32>
    %53 = vector.extract_strided_slice %50 {offsets = [1, 0, 0], sizes = [1, 16, 32], strides = [1, 1, 1]} : vector<4x16x32xf32> to vector<1x16x32xf32>
    %54 = vector.shape_cast %53 : vector<1x16x32xf32> to vector<16x32xf32>
    %55 = arith.addf %52, %54 : vector<16x32xf32>
    %56 = vector.extract_strided_slice %50 {offsets = [2, 0, 0], sizes = [1, 16, 32], strides = [1, 1, 1]} : vector<4x16x32xf32> to vector<1x16x32xf32>
    %57 = vector.shape_cast %56 : vector<1x16x32xf32> to vector<16x32xf32>
    %58 = arith.addf %55, %57 : vector<16x32xf32>
    %59 = vector.extract_strided_slice %50 {offsets = [3, 0, 0], sizes = [1, 16, 32], strides = [1, 1, 1]} : vector<4x16x32xf32> to vector<1x16x32xf32>
    %60 = vector.shape_cast %59 : vector<1x16x32xf32> to vector<16x32xf32>
    %61 = arith.addf %58, %60 : vector<16x32xf32>
    %62 = vector.broadcast %16 : vector<1x32xf32> to vector<16x32xf32>
    %63 = arith.addf %61, %62 : vector<16x32xf32>
    %64 = arith.addf %13, %63 : vector<16x32xf32>
    %cst_25 = arith.constant dense<0.000000e+00> : vector<16xf32>
    %65 = vector.multi_reduction <add>, %64, %cst_25 [1] : vector<16x32xf32> to vector<16xf32>
    %66 = vector.shape_cast %65 : vector<16xf32> to vector<16x1xf32>
    %cst_26 = arith.constant 3.200000e+01 : f32
    %67 = vector.broadcast %cst_26 : f32 to vector<16x1xf32>
    %68 = arith.divf %66, %67 : vector<16x1xf32>
    %69 = vector.broadcast %68 : vector<16x1xf32> to vector<16x32xf32>
    %70 = arith.subf %64, %69 : vector<16x32xf32>
    %71 = arith.mulf %70, %70 : vector<16x32xf32>
    %cst_27 = arith.constant dense<0.000000e+00> : vector<16xf32>
    %72 = vector.multi_reduction <add>, %71, %cst_27 [1] : vector<16x32xf32> to vector<16xf32>
    %73 = vector.shape_cast %72 : vector<16xf32> to vector<16x1xf32>
    %cst_28 = arith.constant 3.200000e+01 : f32
    %74 = vector.broadcast %cst_28 : f32 to vector<16x1xf32>
    %75 = arith.divf %73, %74 : vector<16x1xf32>
    %cst_29 = arith.constant 9.99999974E-6 : f32
    %76 = vector.broadcast %cst_29 : f32 to vector<16x1xf32>
    %77 = arith.addf %75, %76 : vector<16x1xf32>
    %78 = math.rsqrt %77 : vector<16x1xf32>
    %79 = vector.broadcast %78 : vector<16x1xf32> to vector<16x32xf32>
    %80 = arith.mulf %70, %79 : vector<16x32xf32>
    %81 = vector.broadcast %17 : vector<1x32xf32> to vector<16x32xf32>
    %82 = arith.mulf %80, %81 : vector<16x32xf32>
    %83 = vector.broadcast %18 : vector<1x32xf32> to vector<16x32xf32>
    %84 = arith.addf %82, %83 : vector<16x32xf32>
    %c0_30 = arith.constant 0 : index
    %c0_31 = arith.constant 0 : index
    %c0_32 = arith.constant 0 : index
    %85 = vector.load %arg6[%c0_30, %c0_31, %c0_32] : memref<2x32x64xf32, #tpu.memory_space<vmem>>, vector<1x32x64xf32>
    %86 = vector.shape_cast %85 : vector<1x32x64xf32> to vector<32x64xf32>
    %cst_33 = arith.constant dense<0.000000e+00> : vector<16x64xf32>
    %87 = tpu.matmul %84, %86, %cst_33 {dimension_numbers = #tpu.dot_dimension_numbers<[1], [0], [0], [1], [0, 0, 1, 1], [], []>} : vector<16x32xf32>, vector<32x64xf32>, vector<16x64xf32> -> vector<16x64xf32>
    %88 = vector.broadcast %19 : vector<1x64xf32> to vector<16x64xf32>
    %89 = arith.addf %87, %88 : vector<16x64xf32>
    %cst_34 = arith.constant 0.000000e+00 : f32
    %90 = vector.broadcast %cst_34 : f32 to vector<16x64xf32>
    %91 = arith.maximumf %89, %90 : vector<16x64xf32>
    %c0_35 = arith.constant 0 : index
    %c0_36 = arith.constant 0 : index
    %c0_37 = arith.constant 0 : index
    %92 = vector.load %arg7[%c0_35, %c0_36, %c0_37] : memref<2x64x32xf32, #tpu.memory_space<vmem>>, vector<1x64x32xf32>
    %93 = vector.shape_cast %92 : vector<1x64x32xf32> to vector<64x32xf32>
    %cst_38 = arith.constant dense<0.000000e+00> : vector<16x32xf32>
    %94 = tpu.matmul %91, %93, %cst_38 {dimension_numbers = #tpu.dot_dimension_numbers<[1], [0], [0], [1], [0, 0, 1, 1], [], []>} : vector<16x64xf32>, vector<64x32xf32>, vector<16x32xf32> -> vector<16x32xf32>
    %95 = vector.broadcast %20 : vector<1x32xf32> to vector<16x32xf32>
    %96 = arith.addf %94, %95 : vector<16x32xf32>
    %97 = arith.addf %84, %96 : vector<16x32xf32>
    %cst_39 = arith.constant dense<0.000000e+00> : vector<16xf32>
    %98 = vector.multi_reduction <add>, %97, %cst_39 [1] : vector<16x32xf32> to vector<16xf32>
    %99 = vector.shape_cast %98 : vector<16xf32> to vector<16x1xf32>
    %cst_40 = arith.constant 3.200000e+01 : f32
    %100 = vector.broadcast %cst_40 : f32 to vector<16x1xf32>
    %101 = arith.divf %99, %100 : vector<16x1xf32>
    %102 = vector.broadcast %101 : vector<16x1xf32> to vector<16x32xf32>
    %103 = arith.subf %97, %102 : vector<16x32xf32>
    %104 = arith.mulf %103, %103 : vector<16x32xf32>
    %cst_41 = arith.constant dense<0.000000e+00> : vector<16xf32>
    %105 = vector.multi_reduction <add>, %104, %cst_41 [1] : vector<16x32xf32> to vector<16xf32>
    %106 = vector.shape_cast %105 : vector<16xf32> to vector<16x1xf32>
    %cst_42 = arith.constant 3.200000e+01 : f32
    %107 = vector.broadcast %cst_42 : f32 to vector<16x1xf32>
    %108 = arith.divf %106, %107 : vector<16x1xf32>
    %cst_43 = arith.constant 9.99999974E-6 : f32
    %109 = vector.broadcast %cst_43 : f32 to vector<16x1xf32>
    %110 = arith.addf %108, %109 : vector<16x1xf32>
    %111 = math.rsqrt %110 : vector<16x1xf32>
    %112 = vector.broadcast %111 : vector<16x1xf32> to vector<16x32xf32>
    %113 = arith.mulf %103, %112 : vector<16x32xf32>
    %114 = vector.broadcast %21 : vector<1x32xf32> to vector<16x32xf32>
    %115 = arith.mulf %113, %114 : vector<16x32xf32>
    %116 = vector.broadcast %22 : vector<1x32xf32> to vector<16x32xf32>
    %117 = arith.addf %115, %116 : vector<16x32xf32>
    %c1 = arith.constant 1 : index
    %c0_44 = arith.constant 0 : index
    %c0_45 = arith.constant 0 : index
    %118 = vector.load %arg5[%c1, %c0_44, %c0_45] : memref<2x8x64xf32, #tpu.memory_space<vmem>>, vector<1x8x64xf32>
    %119 = vector.shape_cast %118 : vector<1x8x64xf32> to vector<8x64xf32>
    %120 = vector.extract_strided_slice %119 {offsets = [0, 0], sizes = [1, 32], strides = [1, 1]} : vector<8x64xf32> to vector<1x32xf32>
    %121 = vector.extract_strided_slice %119 {offsets = [1, 0], sizes = [1, 32], strides = [1, 1]} : vector<8x64xf32> to vector<1x32xf32>
    %122 = vector.extract_strided_slice %119 {offsets = [2, 0], sizes = [1, 32], strides = [1, 1]} : vector<8x64xf32> to vector<1x32xf32>
    %123 = vector.extract_strided_slice %119 {offsets = [3, 0], sizes = [1, 64], strides = [1, 1]} : vector<8x64xf32> to vector<1x64xf32>
    %124 = vector.extract_strided_slice %119 {offsets = [4, 0], sizes = [1, 32], strides = [1, 1]} : vector<8x64xf32> to vector<1x32xf32>
    %125 = vector.extract_strided_slice %119 {offsets = [5, 0], sizes = [1, 32], strides = [1, 1]} : vector<8x64xf32> to vector<1x32xf32>
    %126 = vector.extract_strided_slice %119 {offsets = [6, 0], sizes = [1, 32], strides = [1, 1]} : vector<8x64xf32> to vector<1x32xf32>
    %127 = vector.shape_cast %117 : vector<16x32xf32> to vector<1x16x32xf32>
    %128 = vector.broadcast %127 : vector<1x16x32xf32> to vector<4x16x32xf32>
    %c1_46 = arith.constant 1 : index
    %c0_47 = arith.constant 0 : index
    %c0_48 = arith.constant 0 : index
    %c0_49 = arith.constant 0 : index
    %129 = vector.load %arg4[%c1_46, %c0_47, %c0_48, %c0_49] : memref<2x4x32x48xf32, #tpu.memory_space<vmem>>, vector<1x4x32x48xf32>
    %130 = vector.shape_cast %129 : vector<1x4x32x48xf32> to vector<4x32x48xf32>
    %cst_50 = arith.constant dense<0.000000e+00> : vector<4x16x48xf32>
    %131 = tpu.matmul %128, %130, %cst_50 {dimension_numbers = #tpu.dot_dimension_numbers<[2], [1], [1], [2], [0, 0, 0, 1, 1, 2], [0], [0]>} : vector<4x16x32xf32>, vector<4x32x48xf32>, vector<4x16x48xf32> -> vector<4x16x48xf32>
    %132 = vector.shape_cast %131 : vector<4x16x48xf32> to vector<8x8x48xf32>
    %133 = vector.extract_strided_slice %132 {offsets = [0, 0, 0], sizes = [8, 8, 8], strides = [1, 1, 1]} : vector<8x8x48xf32> to vector<8x8x8xf32>
    %134 = vector.extract_strided_slice %132 {offsets = [0, 0, 8], sizes = [8, 8, 8], strides = [1, 1, 1]} : vector<8x8x48xf32> to vector<8x8x8xf32>
    %135 = vector.extract_strided_slice %132 {offsets = [0, 0, 16], sizes = [8, 8, 32], strides = [1, 1, 1]} : vector<8x8x48xf32> to vector<8x8x32xf32>
    %cst_51 = arith.constant dense<0.000000e+00> : vector<8x8x8xf32>
    %136 = tpu.matmul %133, %134, %cst_51 {dimension_numbers = #tpu.dot_dimension_numbers<[2], [2], [1], [1], [0, 0, 0, 1, 1, 1], [0], [0]>} : vector<8x8x8xf32>, vector<8x8x8xf32>, vector<8x8x8xf32> -> vector<8x8x8xf32>
    %cst_52 = arith.constant -1.000000e+09 : f32
    %137 = vector.broadcast %cst_52 : f32 to vector<8x8x8xf32>
    %138 = arith.select %2, %136, %137 : vector<8x8x8xi1>, vector<8x8x8xf32>
    %cst_53 = arith.constant dense<0xFF800000> : vector<8x8xf32>
    %139 = vector.multi_reduction <maximumf>, %138, %cst_53 [2] : vector<8x8x8xf32> to vector<8x8xf32>
    %140 = vector.shape_cast %139 : vector<8x8xf32> to vector<8x8x1xf32>
    %141 = vector.broadcast %140 : vector<8x8x1xf32> to vector<8x8x8xf32>
    %142 = arith.subf %138, %141 : vector<8x8x8xf32>
    %143 = math.exp %142 : vector<8x8x8xf32>
    %cst_54 = arith.constant dense<0.000000e+00> : vector<8x8xf32>
    %144 = vector.multi_reduction <add>, %143, %cst_54 [2] : vector<8x8x8xf32> to vector<8x8xf32>
    %145 = vector.shape_cast %144 : vector<8x8xf32> to vector<8x8x1xf32>
    %146 = tpu.reciprocal %145 : vector<8x8x1xf32> -> vector<8x8x1xf32>
    %147 = vector.broadcast %146 : vector<8x8x1xf32> to vector<8x8x8xf32>
    %148 = arith.mulf %143, %147 : vector<8x8x8xf32>
    %149 = vector.shape_cast %148 : vector<8x8x8xf32> to vector<4x2x8x8xf32>
    %c1_55 = arith.constant 1 : index
    %c0_56 = arith.constant 0 : index
    %c0_57 = arith.constant 0 : index
    %c0_58 = arith.constant 0 : index
    %c0_59 = arith.constant 0 : index
    %150 = vector.load %arg11[%c1_55, %c0_56, %c0_57, %c0_58, %c0_59] : memref<2x4x2x8x8xf32, #tpu.memory_space<vmem>>, vector<1x4x2x8x8xf32>
    %151 = vector.shape_cast %150 : vector<1x4x2x8x8xf32> to vector<4x2x8x8xf32>
    %152 = vector.shape_cast %149 : vector<4x2x8x8xf32> to vector<1x4x2x8x8xf32>
    tpu.vector_store %arg11[%c1_55, %c0_56, %c0_57, %c0_58, %c0_59], %152 {strides = array<i32>} : memref<2x4x2x8x8xf32, #tpu.memory_space<vmem>>, vector<1x4x2x8x8xf32>,
    %cst_60 = arith.constant dense<0.000000e+00> : vector<8x8x32xf32>
    %153 = tpu.matmul %148, %135, %cst_60 {dimension_numbers = #tpu.dot_dimension_numbers<[2], [1], [1], [2], [0, 0, 0, 1, 1, 2], [0], [0]>} : vector<8x8x8xf32>, vector<8x8x32xf32>, vector<8x8x32xf32> -> vector<8x8x32xf32>
    %154 = vector.shape_cast %153 : vector<8x8x32xf32> to vector<4x16x32xf32>
    %155 = vector.extract_strided_slice %154 {offsets = [0, 0, 0], sizes = [1, 16, 32], strides = [1, 1, 1]} : vector<4x16x32xf32> to vector<1x16x32xf32>
    %156 = vector.shape_cast %155 : vector<1x16x32xf32> to vector<16x32xf32>
    %157 = vector.extract_strided_slice %154 {offsets = [1, 0, 0], sizes = [1, 16, 32], strides = [1, 1, 1]} : vector<4x16x32xf32> to vector<1x16x32xf32>
    %158 = vector.shape_cast %157 : vector<1x16x32xf32> to vector<16x32xf32>
    %159 = arith.addf %156, %158 : vector<16x32xf32>
    %160 = vector.extract_strided_slice %154 {offsets = [2, 0, 0], sizes = [1, 16, 32], strides = [1, 1, 1]} : vector<4x16x32xf32> to vector<1x16x32xf32>
    %161 = vector.shape_cast %160 : vector<1x16x32xf32> to vector<16x32xf32>
    %162 = arith.addf %159, %161 : vector<16x32xf32>
    %163 = vector.extract_strided_slice %154 {offsets = [3, 0, 0], sizes = [1, 16, 32], strides = [1, 1, 1]} : vector<4x16x32xf32> to vector<1x16x32xf32>
    %164 = vector.shape_cast %163 : vector<1x16x32xf32> to vector<16x32xf32>
    %165 = arith.addf %162, %164 : vector<16x32xf32>
    %166 = vector.broadcast %120 : vector<1x32xf32> to vector<16x32xf32>
    %167 = arith.addf %165, %166 : vector<16x32xf32>
    %168 = arith.addf %117, %167 : vector<16x32xf32>
    %cst_61 = arith.constant dense<0.000000e+00> : vector<16xf32>
    %169 = vector.multi_reduction <add>, %168, %cst_61 [1] : vector<16x32xf32> to vector<16xf32>
    %170 = vector.shape_cast %169 : vector<16xf32> to vector<16x1xf32>
    %cst_62 = arith.constant 3.200000e+01 : f32
    %171 = vector.broadcast %cst_62 : f32 to vector<16x1xf32>
    %172 = arith.divf %170, %171 : vector<16x1xf32>
    %173 = vector.broadcast %172 : vector<16x1xf32> to vector<16x32xf32>
    %174 = arith.subf %168, %173 : vector<16x32xf32>
    %175 = arith.mulf %174, %174 : vector<16x32xf32>
    %cst_63 = arith.constant dense<0.000000e+00> : vector<16xf32>
    %176 = vector.multi_reduction <add>, %175, %cst_63 [1] : vector<16x32xf32> to vector<16xf32>
    %177 = vector.shape_cast %176 : vector<16xf32> to vector<16x1xf32>
    %cst_64 = arith.constant 3.200000e+01 : f32
    %178 = vector.broadcast %cst_64 : f32 to vector<16x1xf32>
    %179 = arith.divf %177, %178 : vector<16x1xf32>
    %cst_65 = arith.constant 9.99999974E-6 : f32
    %180 = vector.broadcast %cst_65 : f32 to vector<16x1xf32>
    %181 = arith.addf %179, %180 : vector<16x1xf32>
    %182 = math.rsqrt %181 : vector<16x1xf32>
    %183 = vector.broadcast %182 : vector<16x1xf32> to vector<16x32xf32>
    %184 = arith.mulf %174, %183 : vector<16x32xf32>
    %185 = vector.broadcast %121 : vector<1x32xf32> to vector<16x32xf32>
    %186 = arith.mulf %184, %185 : vector<16x32xf32>
    %187 = vector.broadcast %122 : vector<1x32xf32> to vector<16x32xf32>
    %188 = arith.addf %186, %187 : vector<16x32xf32>
    %c1_66 = arith.constant 1 : index
    %c0_67 = arith.constant 0 : index
    %c0_68 = arith.constant 0 : index
    %189 = vector.load %arg6[%c1_66, %c0_67, %c0_68] : memref<2x32x64xf32, #tpu.memory_space<vmem>>, vector<1x32x64xf32>
    %190 = vector.shape_cast %189 : vector<1x32x64xf32> to vector<32x64xf32>
    %cst_69 = arith.constant dense<0.000000e+00> : vector<16x64xf32>
    %191 = tpu.matmul %188, %190, %cst_69 {dimension_numbers = #tpu.dot_dimension_numbers<[1], [0], [0], [1], [0, 0, 1, 1], [], []>} : vector<16x32xf32>, vector<32x64xf32>, vector<16x64xf32> -> vector<16x64xf32>
    %192 = vector.broadcast %123 : vector<1x64xf32> to vector<16x64xf32>
    %193 = arith.addf %191, %192 : vector<16x64xf32>
    %cst_70 = arith.constant 0.000000e+00 : f32
    %194 = vector.broadcast %cst_70 : f32 to vector<16x64xf32>
    %195 = arith.maximumf %193, %194 : vector<16x64xf32>
    %c1_71 = arith.constant 1 : index
    %c0_72 = arith.constant 0 : index
    %c0_73 = arith.constant 0 : index
    %196 = vector.load %arg7[%c1_71, %c0_72, %c0_73] : memref<2x64x32xf32, #tpu.memory_space<vmem>>, vector<1x64x32xf32>
    %197 = vector.shape_cast %196 : vector<1x64x32xf32> to vector<64x32xf32>
    %cst_74 = arith.constant dense<0.000000e+00> : vector<16x32xf32>
    %198 = tpu.matmul %195, %197, %cst_74 {dimension_numbers = #tpu.dot_dimension_numbers<[1], [0], [0], [1], [0, 0, 1, 1], [], []>} : vector<16x64xf32>, vector<64x32xf32>, vector<16x32xf32> -> vector<16x32xf32>
    %199 = vector.broadcast %124 : vector<1x32xf32> to vector<16x32xf32>
    %200 = arith.addf %198, %199 : vector<16x32xf32>
    %201 = arith.addf %188, %200 : vector<16x32xf32>
    %cst_75 = arith.constant dense<0.000000e+00> : vector<16xf32>
    %202 = vector.multi_reduction <add>, %201, %cst_75 [1] : vector<16x32xf32> to vector<16xf32>
    %203 = vector.shape_cast %202 : vector<16xf32> to vector<16x1xf32>
    %cst_76 = arith.constant 3.200000e+01 : f32
    %204 = vector.broadcast %cst_76 : f32 to vector<16x1xf32>
    %205 = arith.divf %203, %204 : vector<16x1xf32>
    %206 = vector.broadcast %205 : vector<16x1xf32> to vector<16x32xf32>
    %207 = arith.subf %201, %206 : vector<16x32xf32>
    %208 = arith.mulf %207, %207 : vector<16x32xf32>
    %cst_77 = arith.constant dense<0.000000e+00> : vector<16xf32>
    %209 = vector.multi_reduction <add>, %208, %cst_77 [1] : vector<16x32xf32> to vector<16xf32>
    %210 = vector.shape_cast %209 : vector<16xf32> to vector<16x1xf32>
    %cst_78 = arith.constant 3.200000e+01 : f32
    %211 = vector.broadcast %cst_78 : f32 to vector<16x1xf32>
    %212 = arith.divf %210, %211 : vector<16x1xf32>
    %cst_79 = arith.constant 9.99999974E-6 : f32
    %213 = vector.broadcast %cst_79 : f32 to vector<16x1xf32>
    %214 = arith.addf %212, %213 : vector<16x1xf32>
    %215 = math.rsqrt %214 : vector<16x1xf32>
    %216 = vector.broadcast %215 : vector<16x1xf32> to vector<16x32xf32>
    %217 = arith.mulf %207, %216 : vector<16x32xf32>
    %218 = vector.broadcast %125 : vector<1x32xf32> to vector<16x32xf32>
    %219 = arith.mulf %217, %218 : vector<16x32xf32>
    %220 = vector.broadcast %126 : vector<1x32xf32> to vector<16x32xf32>
    %221 = arith.addf %219, %220 : vector<16x32xf32>
    %c0_80 = arith.constant 0 : index
    %c0_81 = arith.constant 0 : index
    %222 = vector.load %arg8[%c0_80, %c0_81] : memref<8x128xf32, #tpu.memory_space<vmem>>, vector<8x128xf32>
    %223 = vector.extract_strided_slice %222 {offsets = [0, 0], sizes = [1, 32], strides = [1, 1]} : vector<8x128xf32> to vector<1x32xf32>
    %224 = vector.extract_strided_slice %222 {offsets = [1, 0], sizes = [1, 32], strides = [1, 1]} : vector<8x128xf32> to vector<1x32xf32>
    %cst_82 = arith.constant dense<0.000000e+00> : vector<16xf32>
    %225 = vector.multi_reduction <add>, %221, %cst_82 [1] : vector<16x32xf32> to vector<16xf32>
    %226 = vector.shape_cast %225 : vector<16xf32> to vector<16x1xf32>
    %cst_83 = arith.constant 3.200000e+01 : f32
    %227 = vector.broadcast %cst_83 : f32 to vector<16x1xf32>
    %228 = arith.divf %226, %227 : vector<16x1xf32>
    %229 = vector.broadcast %228 : vector<16x1xf32> to vector<16x32xf32>
    %230 = arith.subf %221, %229 : vector<16x32xf32>
    %231 = arith.mulf %230, %230 : vector<16x32xf32>
    %cst_84 = arith.constant dense<0.000000e+00> : vector<16xf32>
    %232 = vector.multi_reduction <add>, %231, %cst_84 [1] : vector<16x32xf32> to vector<16xf32>
    %233 = vector.shape_cast %232 : vector<16xf32> to vector<16x1xf32>
    %cst_85 = arith.constant 3.200000e+01 : f32
    %234 = vector.broadcast %cst_85 : f32 to vector<16x1xf32>
    %235 = arith.divf %233, %234 : vector<16x1xf32>
    %cst_86 = arith.constant 9.99999974E-6 : f32
    %236 = vector.broadcast %cst_86 : f32 to vector<16x1xf32>
    %237 = arith.addf %235, %236 : vector<16x1xf32>
    %238 = math.rsqrt %237 : vector<16x1xf32>
    %239 = vector.broadcast %238 : vector<16x1xf32> to vector<16x32xf32>
    %240 = arith.mulf %230, %239 : vector<16x32xf32>
    %241 = vector.broadcast %223 : vector<1x32xf32> to vector<16x32xf32>
    %242 = arith.mulf %240, %241 : vector<16x32xf32>
    %243 = vector.broadcast %224 : vector<1x32xf32> to vector<16x32xf32>
    %244 = arith.addf %242, %243 : vector<16x32xf32>
    %c0_87 = arith.constant 0 : index
    %c0_88 = arith.constant 0 : index
    %245 = vector.load %arg9[%c0_87, %c0_88] : memref<32x128xf32, #tpu.memory_space<vmem>>, vector<32x128xf32>
    %cst_89 = arith.constant dense<0.000000e+00> : vector<16x128xf32>
    %246 = tpu.matmul %244, %245, %cst_89 {dimension_numbers = #tpu.dot_dimension_numbers<[1], [0], [0], [1], [0, 0, 1, 1], [], []>} : vector<16x32xf32>, vector<32x128xf32>, vector<16x128xf32> -> vector<16x128xf32>
    %247 = vector.extract_strided_slice %222 {offsets = [2, 0], sizes = [1, 128], strides = [1, 1]} : vector<8x128xf32> to vector<1x128xf32>
    %248 = vector.broadcast %247 : vector<1x128xf32> to vector<16x128xf32>
    %249 = arith.addf %246, %248 : vector<16x128xf32>
    %250 = vector.shape_cast %249 : vector<16x128xf32> to vector<2x8x128xf32>
    %c0_90 = arith.constant 0 : index
    %c0_91 = arith.constant 0 : index
    %c0_92 = arith.constant 0 : index
    %251 = vector.load %arg10[%c0_90, %c0_91, %c0_92] : memref<2x8x128xf32, #tpu.memory_space<vmem>>, vector<2x8x128xf32>
    tpu.vector_store %arg10[%c0_90, %c0_91, %c0_92], %250 {strides = array<i32>} : memref<2x8x128xf32, #tpu.memory_space<vmem>>, vector<2x8x128xf32>,
    return
  }
  func.func @transform_0(%arg0: i32) -> (i32, i32) {
    %c0_i32 = arith.constant 0 : i32
    %c0_i32_0 = arith.constant 0 : i32
    return %arg0, %c0_i32 : i32, i32
  }
  func.func @transform_1(%arg0: i32) -> (i32, i32) {
    %c0_i32 = arith.constant 0 : i32
    %c0_i32_0 = arith.constant 0 : i32
    %c0_i32_1 = arith.constant 0 : i32
    return %c0_i32, %c0_i32_0 : i32, i32
  }
  func.func @transform_2(%arg0: i32) -> (i32, i32) {
    %c0_i32 = arith.constant 0 : i32
    %c0_i32_0 = arith.constant 0 : i32
    return %arg0, %c0_i32 : i32, i32
  }
  func.func @transform_3(%arg0: i32) -> (i32, i32, i32, i32) {
    %c0_i32 = arith.constant 0 : i32
    %c0_i32_0 = arith.constant 0 : i32
    %c0_i32_1 = arith.constant 0 : i32
    %c0_i32_2 = arith.constant 0 : i32
    %c0_i32_3 = arith.constant 0 : i32
    return %c0_i32, %c0_i32_0, %c0_i32_1, %c0_i32_2 : i32, i32, i32, i32
  }
  func.func @transform_4(%arg0: i32) -> (i32, i32, i32) {
    %c0_i32 = arith.constant 0 : i32
    %c0_i32_0 = arith.constant 0 : i32
    %c0_i32_1 = arith.constant 0 : i32
    %c0_i32_2 = arith.constant 0 : i32
    return %c0_i32, %c0_i32_0, %c0_i32_1 : i32, i32, i32
  }
  func.func @transform_5(%arg0: i32) -> (i32, i32, i32) {
    %c0_i32 = arith.constant 0 : i32
    %c0_i32_0 = arith.constant 0 : i32
    %c0_i32_1 = arith.constant 0 : i32
    %c0_i32_2 = arith.constant 0 : i32
    return %c0_i32, %c0_i32_0, %c0_i32_1 : i32, i32, i32
  }
  func.func @transform_6(%arg0: i32) -> (i32, i32, i32) {
    %c0_i32 = arith.constant 0 : i32
    %c0_i32_0 = arith.constant 0 : i32
    %c0_i32_1 = arith.constant 0 : i32
    %c0_i32_2 = arith.constant 0 : i32
    return %c0_i32, %c0_i32_0, %c0_i32_1 : i32, i32, i32
  }
  func.func @transform_7(%arg0: i32) -> (i32, i32) {
    %c0_i32 = arith.constant 0 : i32
    %c0_i32_0 = arith.constant 0 : i32
    %c0_i32_1 = arith.constant 0 : i32
    return %c0_i32, %c0_i32_0 : i32, i32
  }
  func.func @transform_8(%arg0: i32) -> (i32, i32) {
    %c0_i32 = arith.constant 0 : i32
    %c0_i32_0 = arith.constant 0 : i32
    %c0_i32_1 = arith.constant 0 : i32
    return %c0_i32, %c0_i32_0 : i32, i32
  }
  func.func @transform_9(%arg0: i32) -> (i32, i32, i32) {
    %c0_i32 = arith.constant 0 : i32
    %c0_i32_0 = arith.constant 0 : i32
    %c0_i32_1 = arith.constant 0 : i32
    return %arg0, %c0_i32, %c0_i32_0 : i32, i32, i32
  }
  func.func @transform_10(%arg0: i32) -> (i32, i32, i32, i32, i32) {
    %c0_i32 = arith.constant 0 : i32
    %c0_i32_0 = arith.constant 0 : i32
    %c0_i32_1 = arith.constant 0 : i32
    %c0_i32_2 = arith.constant 0 : i32
    %c0_i32_3 = arith.constant 0 : i32
    return %c0_i32, %c0_i32_0, %arg0, %c0_i32_1, %c0_i32_2 : i32, i32, i32, i32, i32
  }
}

</mosaic_0001>

<bundles_post_ra>
// kernel: forward.1
= control target key start
LH: loop header
LB: loop body
LE: loop exit
PB: predicated region body
PF: predicated region fallthrough
CT: control target
= control target key end

     0   :  { %16 = vsyncpa [#allocation3], 0  ;;  %s3119_s0 = inlined_call_operand.vmem [shape: s32[16,1], index: 0, kind: input, shape index: {}]   ;;  %s3120_s1 = inlined_call_operand.vmem [shape: f32[64,32], index: 1, kind: input, shape index: {}]   ;;  %s3121_s2 = inlined_call_operand.vmem [shape: f32[16,32], index: 2, kind: input, shape index: {}]   ;;  %s3122_s3 = inlined_call_operand.hbm [shape: f32[2,4,32,48], index: 3, kind: input, shape index: {}]   ;;  %s3123_s4 = inlined_call_operand.vmem [shape: f32[2,8,64], index: 4, kind: input, shape index: {}]   ;;  %s3124_s5 = inlined_call_operand.vmem [shape: f32[2,32,64], index: 5, kind: input, shape index: {}]   ;;  %s3125_s6 = inlined_call_operand.vmem [shape: f32[2,64,32], index: 6, kind: input, shape index: {}]   ;;  %s3126_s7 = inlined_call_operand.vmem [shape: f32[8,128], index: 7, kind: input, shape index: {}]   ;;  %s3127_s8 = inlined_call_operand.vmem [shape: f32[32,128], index: 8, kind: input, shape index: {}]   ;;  %s3128_s9 = inlined_call_operand.hbm [shape: f32[2,8,128], index: 9, kind: output, shape index: {0}]   ;;  %s3129_s10 = inlined_call_operand.vmem [shape: f32[2,4,2,8,8], index: 10, kind: output, shape index: {1}]  }
   0x1   :  { %17 = vsyncpa [#allocation4], 0  ;;  %s28_s15 = sshll.u32 %s3122_s3, 4  ;;  %s2375_s16 = smov [#allocation2]   ;;  %s29_s15 = int_to_ptr.hbm [resolvable:$true] %s28_s15 }
   0x2   :  { %s30_s17 = sshll.u32 %s2375_s16, 4  ;;  %s2376_s18 = smov 128   ;;  %s31_s17 = int_to_ptr.vmem [resolvable:$true] %s30_s17 }
   0x3   :  { %s2377_s19 = smov 8  }
   0x4   :  { %36 = dma.hbm_to_vmem [thread:$0]  %s29_s15, 4096, %s31_s17, [#allocation3], %s2376_s18, %s2376_s18, %s2377_s19  }
   0x5   :  { %2371 = dma.done.wait [#allocation3], 4096  }
   0x6   :  { %2372 = vsyncadd [#allocation3], 4294963200  ;;  %v2378_v0 = vmov 0   ;;  %v56_v1 = vld [vmem:[%s3119_s0] sm:$0xff]  ;;  %v75_v2 = vld [vmem:[%s3120_s1 + $0x38] sm:$0xff]  ;;  %v51_v17 = vlaneseq  ;;  %vm78_vm0 = vcmask 523264  }
   0x7   :  { %2206 = vset.pattern.permute.xlu0 %v2378_v0  ;;  %93 = vmatpush.msra.mxu0 %v75_v2  ;;  %v74_v3 = vld [vmem:[%s3120_s1 + $0x30] sm:$0xff]  ;;  %v73_v4 = vld [vmem:[%s3120_s1 + $0x28] sm:$0xff]  ;;  %v72_v5 = vld [vmem:[%s3120_s1 + $0x20] sm:$0xff]  ;;  %v2379_v20 = vmov 0.0   ;;  %vm125_vm3 = vcmask 261120   ;;  %vm227_vm4 = vcmask 64512  }
   0x8   :  { %59 = vperm.xlu0 %2206, %v56_v1   ;;  %v57_v6 = vld [vmem:[%s3119_s0 + $0x8] sm:$0xff]  ;;  %v71_v7 = vld [vmem:[%s3120_s1 + $0x18] sm:$0xff]  ;;  %v70_v8 = vld [vmem:[%s3120_s1 + $0x10] sm:$0xff]  ;;  %v2476_v18 = vand.u32 127, %v51_v17  ;;  %v52_v56 = vshrl.u32 %v51_v17, 7  ;;  %s2381_s3 = smov 112  }
   0x9   :  { %94 = vmatpush.msra.mxu0 %v74_v3  ;;  %v69_v9 = vld [vmem:[%s3120_s1 + $0x8] sm:$0xff]  ;;  %v68_v10 = vld [vmem:[%s3120_s1] sm:$0xff]  ;;  %v112_v11 = vld [vmem:[#allocation2 + $0x18] sm:$0xff]  ;;  %s2083_s27 = sshll.u32 %s3128_s9, 4  ;;  %s2084_s27 = int_to_ptr.hbm [resolvable:$true] %s2083_s27 }
   0xa   :  { %v116_v12 = vld [vmem:[#allocation2 + $0x38] sm:$0xff]  ;;  %144 = vmatpush.msra.mxu3 %v112_v11  ;;  %v111_v14 = vld [vmem:[#allocation2 + $0x10] sm:$0xff]  ;;  %v110_v24 = vld [vmem:[#allocation2 + $0x8] sm:$0xff]  ;;  %vm2566_vm5 = vcmp.ge.s32.totalorder %v52_v56, %v2476_v18 }
   0xb   :  { %95 = vmatpush.msra.mxu0 %v73_v4  ;;  %v124_v13 = vld [vmem:[#allocation2 + $0x78] sm:$0xff]  ;;  %167 = vmatpush.msra.mxu2 %v116_v12  ;;  %v115_v15 = vld [vmem:[#allocation2 + $0x30] sm:$0xff]  ;;  %v114_v25 = vld [vmem:[#allocation2 + $0x28] sm:$0xff] }
   0xc   :  { %v123_v16 = vld [vmem:[#allocation2 + $0x70] sm:$0xff]  ;;  %213 = vmatpush.msra.mxu1 %v124_v13  ;;  %145 = vmatpush.msra.mxu3 %v111_v14  ;;  %v122_v26 = vld [vmem:[#allocation2 + $0x68] sm:$0xff]  ;;  %v109_v27 = vld [vmem:[#allocation2] sm:$0xff] }
   0xd   :  { %96 = vmatpush.msra.mxu0 %v72_v5  ;;  %168 = vmatpush.msra.mxu2 %v115_v15  ;;  %v113_v28 = vld [vmem:[#allocation2 + $0x20] sm:$0xff]  ;;  %v120_v30 = vld [vmem:[#allocation2 + $0x58] sm:$0xff]  ;;  %v119_v31 = vld [vmem:[#allocation2 + $0x50] sm:$0xff] }
   0xe   :  { %214 = vmatpush.msra.mxu1 %v123_v16  ;;  %146 = vmatpush.msra.mxu3 %v110_v24  ;;  %v121_v29 = vld [vmem:[#allocation2 + $0x60] sm:$0xff]  ;;  %v118_v32 = vld [vmem:[#allocation2 + $0x48] sm:$0xff] }
   0xf   :  { %97 = vmatpush.msra.mxu0 %v71_v7  ;;  %169 = vmatpush.msra.mxu2 %v114_v25  ;;  %v117_v33 = vld [vmem:[#allocation2 + $0x40] sm:$0xff]  ;;  %v77_v37 = vld [vmem:[%s3121_s2 + $0x8] sm:$0xff] }
  0x10   :  { %62 = vperm.xlu0 %2206, %v57_v6   ;;  %215 = vmatpush.msra.mxu1 %v122_v26  ;;  %v76_v34 = vld [vmem:[%s3121_s2] sm:$0xff]  ;;  %s2380_s2 = smov 120  }
  0x11   :  { %98 = vmatpush.msra.mxu0 %v70_v8  ;;  %147 = vmatpush.msra.mxu3 %v109_v27 }
  0x12   :  { %170 = vmatpush.msra.mxu2 %v113_v28  ;;  %216 = vmatpush.msra.mxu1 %v121_v29 }
  0x13   :  { %99 = vmatpush.msra.mxu0 %v69_v9  ;;  %190 = vmatpush.msrb.mxu3 %v120_v30 }
  0x15   :  { %100 = vmatpush.msra.mxu0 %v68_v10  ;;  %191 = vmatpush.msrb.mxu3 %v119_v31 }
  0x17   :  { %192 = vmatpush.msrb.mxu3 %v118_v32 }
  0x19   :  { %193 = vmatpush.msrb.mxu3 %v117_v33 }
  0x7a   :  { %v60_v19 = vpop.permute.xlu0 %59 }
  0x7b   :  { %vm64_vm1 = vcmp.eq.s32.totalorder %v60_v19, %v2476_v18 }
  0x7c   :  { %v66_v21 = vsel %vm64_vm1, 1.0, %v2379_v20 }
  0x7d   :  { %2100 = vmatmul.msk.f32.vlgmr.msra.gmra.mxu0 %vm78_vm0, %v66_v21 }
  0x82   :  { %v63_v22 = vpop.permute.xlu0 %62 }
  0x83   :  { %vm65_vm2 = vcmp.eq.s32.totalorder %v63_v22, %v2476_v18 }
  0x84   :  { %v67_v23 = vsel %vm65_vm2, 1.0, %v2379_v20 }
  0x85   :  { %2101 = vmatmul.msk.f32.gmra.mxu0 %vm78_vm0, %v67_v23 }
  0xfa   :  { %v102_v35 = vpop.f32.mrf.mxu0 }
  0xfb   :  { %v2485_v36 = vadd.f32 %v102_v35, %v76_v34 }
  0xfd   :  { %2102 = vmatmul.msk.f32.vlgmr.msra.gmra.mxu3 %vm125_vm3, %v2485_v36  ;;  %2104 = vmatmul.msk.f32.vlgmr.msra.gmra.mxu2 %vm125_vm3, %v2485_v36 }
  0xfe   :  { %2108 = vmatmul.msk.f32.vlgmr.msra.gmra.mxu1 %vm125_vm3, %v2485_v36 }
 0x102   :  { %v105_v38 = vpop.f32.mrf.mxu0 }
 0x103   :  { %v2496_v39 = vadd.f32 %v105_v38, %v77_v37 }
 0x105   :  { %2103 = vmatmul.msk.f32.gmra.mxu3 %vm125_vm3, %v2496_v39  ;;  %2105 = vmatmul.msk.f32.gmra.mxu2 %vm125_vm3, %v2496_v39 }
 0x106   :  { %2109 = vmatmul.msk.f32.gmra.mxu1 %vm125_vm3, %v2496_v39 }
 0x10d   :  { %2106 = vmatmul.msk.f32.vlgmr.msrb.gmra.mxu3 %vm125_vm3, %v2485_v36 }
 0x115   :  { %2107 = vmatmul.msk.f32.gmra.mxu3 %vm125_vm3, %v2496_v39 }
 0x17b   :  { %v2516_v42 = vpop.f32.mrf.mxu1 }
 0x180   :  { %v2508_v40 = vpop.f32.mrf.mxu3  ;;  %v2510_v41 = vpop.f32.mrf.mxu2 }
 0x181   :  { %280 = vrot.lane.b32.xlu0 %v2510_v41, %s2380_s2  ;;  %225 = vrot.lane.b32.xlu1 %v2508_v40, %s2380_s2  ;;  %v2207_v18 = vpack.i.bf16 %v2510_v41, %v2508_v40 }
 0x183   :  { %v2522_v44 = vpop.f32.mrf.mxu1 }
 0x188   :  { %v2518_v43 = vpop.f32.mrf.mxu3  ;;  %v2530_v46 = vpop.f32.mrf.mxu2 }
 0x189   :  { %253 = vrot.lane.b32.xlu1 %v2518_v43, %s2380_s2 }
 0x190   :  { %v2524_v45 = vpop.f32.mrf.mxu3 }
 0x191   :  { %415 = vrot.lane.b32.xlu1 %v2522_v44, %s2380_s2  ;;  %334 = vrot.lane.b32.xlu2 %v2524_v45, %s2380_s2 }
 0x198   :  { %v2532_v47 = vpop.f32.mrf.mxu3 }
 0x199   :  { %307 = vrot.lane.b32.xlu2 %v2530_v46, %s2380_s2  ;;  %361 = vrot.lane.b32.xlu0 %v2532_v47, %s2380_s2 }
 0x1a1   :  { %388 = vrot.lane.b32.xlu2 %v2516_v42, %s2380_s2 }
 0x1eb   :  { %v335_v48 = vpop.permute.xlu2 %334 }
 0x1f3   :  { %v226_v49 = vpop.permute.xlu1 %225  ;;  %v308_v50 = vpop.permute.xlu2 %307 }
 0x1f4   :  { %v281_v51 = vpop.permute.xlu0 %280  ;;  %2110 = vmatpush.xpose.msk.msrb.mxu2 %vm227_vm4, %v226_v49 }
 0x1f5   :  { %2114 = vmatpush.xpose.msk.msrb.mxu0 %vm227_vm4, %v281_v51 }
 0x1f7   :  { %2111 = vmatmul.msk.f32.vlgmr.msrb.gmra.mxu2 %vm227_vm4, %v2508_v40 }
 0x1f8   :  { %2116 = vmatpush.xpose.msk.msra.mxu2 %vm227_vm4, %v308_v50  ;;  %2115 = vmatmul.msk.f32.vlgmr.msrb.gmra.mxu0 %vm227_vm4, %v2510_v41 }
 0x1fb   :  { %v254_v52 = vpop.permute.xlu1 %253  ;;  %v389_v53 = vpop.permute.xlu2 %388 }
 0x1fc   :  { %2112 = vmatpush.xpose.msk.msra.mxu3 %vm227_vm4, %v254_v52  ;;  %2122 = vmatpush.xpose.msk.msrb.mxu1 %vm227_vm4, %v389_v53 }
 0x1ff   :  { %2113 = vmatmul.msk.f32.vlgmr.msra.gmra.mxu3 %vm227_vm4, %v2518_v43  ;;  %2117 = vmatmul.msk.f32.vlgmr.msra.gmra.mxu2 %vm227_vm4, %v2530_v46 }
 0x200   :  { %2118 = vmatpush.xpose.msk.msrb.mxu3 %vm227_vm4, %v335_v48  ;;  %2123 = vmatmul.msk.f32.vlgmr.msrb.gmra.mxu1 %vm227_vm4, %v2516_v42 }
 0x203   :  { %v416_v54 = vpop.permute.xlu1 %415 }
 0x204   :  { %2124 = vmatpush.xpose.msk.msrb.mxu2 %vm227_vm4, %v416_v54 }
 0x207   :  { %2119 = vmatmul.msk.f32.vlgmr.msrb.gmra.mxu3 %vm227_vm4, %v2524_v45  ;;  %2125 = vmatmul.msk.f32.vlgmr.msrb.gmra.mxu2 %vm227_vm4, %v2522_v44 }
 0x20b   :  { %v362_v55 = vpop.permute.xlu0 %361 }
 0x20c   :  { %2120 = vmatpush.xpose.msk.msra.mxu0 %vm227_vm4, %v362_v55 }
 0x20f   :  { %2121 = vmatmul.msk.f32.vlgmr.msra.gmra.mxu0 %vm227_vm4, %v2532_v47 }
 0x275   :  { %v303_v58 = vpop.f32.mrf.mxu0 }
 0x276   :  { %v443_v59 = vsel %vm2566_vm5, %v303_v58, -1e+09 }
 0x277   :  { %v455_v60 = vsel %vm227_vm4, %v443_v59, -inf }
 0x278   :  { %456 = vmax.xlane.f32.xlu2 %v455_v60 }
 0x27a   :  { %v249_v61 = vpop.f32.mrf.mxu2 }
 0x27b   :  { %v441_v62 = vsel %vm2566_vm5, %v249_v61, -1e+09 }
 0x27c   :  { %v449_v63 = vsel %vm227_vm4, %v441_v62, -inf }
 0x27d   :  { %450 = vmax.xlane.f32.xlu1 %v449_v63  ;;  %v411_v6 = vpop.f32.mrf.mxu1 }
 0x27e   :  { %v447_v7 = vsel %vm2566_vm5, %v411_v6, -1e+09 }
 0x27f   :  { %v467_v12 = vsel %vm227_vm4, %v447_v7, -inf }
 0x282   :  { %v276_v0 = vpop.f32.mrf.mxu3  ;;  %v330_v1 = vpop.f32.mrf.mxu2 }
 0x283   :  { %v442_v2 = vsel %vm2566_vm5, %v276_v0, -1e+09  ;;  %v444_v3 = vsel %vm2566_vm5, %v330_v1, -1e+09 }
 0x284   :  { %v452_v4 = vsel %vm227_vm4, %v442_v2, -inf  ;;  %v458_v5 = vsel %vm227_vm4, %v444_v3, -inf }
 0x285   :  { %453 = vmax.xlane.f32.xlu1 %v452_v4  ;;  %459 = vmax.xlane.f32.xlu2 %v458_v5 }
 0x28a   :  { %v357_v8 = vpop.f32.mrf.mxu3  ;;  %v438_v14 = vpop.f32.mrf.mxu2 }
 0x28b   :  { %v445_v9 = vsel %vm2566_vm5, %v357_v8, -1e+09  ;;  %v448_v16 = vsel %vm2566_vm5, %v438_v14, -1e+09 }
 0x28c   :  { %v384_v10 = vpop.f32.mrf.mxu0  ;;  %v461_v11 = vsel %vm227_vm4, %v445_v9, -inf  ;;  %v470_v17 = vsel %vm227_vm4, %v448_v16, -inf }
 0x28d   :  { %v446_v13 = vsel %vm2566_vm5, %v384_v10, -1e+09  ;;  %462 = vmax.xlane.f32.xlu0 %v461_v11  ;;  %468 = vmax.xlane.f32.xlu2 %v467_v12 }
 0x28e   :  { %v464_v15 = vsel %vm227_vm4, %v446_v13, -inf }
 0x28f   :  { %465 = vmax.xlane.f32.xlu1 %v464_v15 }
 0x295   :  { %471 = vmax.xlane.f32.xlu0 %v470_v17 }
 0x2a9   :  { %2208 = vrot.lane.b32.xlu0 %v2207_v18, %s2381_s3 }
 0x2eb   :  { %v457_v19 = vpop.xlane.xlu2 %456 }
 0x2ec   :  { %v475_v20 = vsub.f32 %v443_v59, %v457_v19 }
 0x2ee   :  { %v485_v21 = vmul.f32 1.442695, %v475_v20 }
 0x2f0   :  { %2237 = vpow2.f32 %v485_v21  ;;  %v451_v22 = vpop.xlane.xlu1 %450 }
 0x2f1   :  { %v473_v23 = vsub.f32 %v441_v62, %v451_v22 }
 0x2f3   :  { %v481_v24 = vmul.f32 1.442695, %v473_v23 }
 0x2f5   :  { %2239 = vpow2.f32 %v481_v24 }
 0x2f6   :  { %v2597_v25 = vpop.eup %2237 }
 0x2f7   :  { %v503_v26 = vsel %vm227_vm4, %v2597_v25, 0.0 }
 0x2f8   :  { %504 = vadd.xlane.f32.xlu0 %v503_v26  ;;  %v454_v27 = vpop.xlane.xlu1 %453  ;;  %v460_v28 = vpop.xlane.xlu2 %459 }
 0x2f9   :  { %v474_v29 = vsub.f32 %v442_v2, %v454_v27  ;;  %v476_v30 = vsub.f32 %v444_v3, %v460_v28 }
 0x2fb   :  { %v2601_v31 = vpop.eup %2239  ;;  %v483_v32 = vmul.f32 1.442695, %v474_v29  ;;  %v487_v33 = vmul.f32 1.442695, %v476_v30 }
 0x2fc   :  { %v497_v34 = vsel %vm227_vm4, %v2601_v31, 0.0 }
 0x2fd   :  { %2241 = vpow2.f32 %v483_v32  ;;  %498 = vadd.xlane.f32.xlu2 %v497_v34 }
 0x2fe   :  { %2243 = vpow2.f32 %v487_v33 }
 0x300   :  { %v469_v35 = vpop.xlane.xlu2 %468  ;;  %v463_v37 = vpop.xlane.xlu0 %462 }
 0x301   :  { %v479_v38 = vsub.f32 %v447_v7, %v469_v35  ;;  %v477_v48 = vsub.f32 %v445_v9, %v463_v37  ;;  %v2212_v7 = vpack.i.bf16 %v2530_v46, %v2524_v45 }
 0x302   :  { %v466_v53 = vpop.xlane.xlu1 %465 }
 0x303   :  { %v2605_v40 = vpop.eup %2241  ;;  %v493_v41 = vmul.f32 1.442695, %v479_v38  ;;  %v489_v52 = vmul.f32 1.442695, %v477_v48  ;;  %v478_v58 = vsub.f32 %v446_v13, %v466_v53 }
 0x304   :  { %v2607_v49 = vpop.eup %2243  ;;  %v500_v50 = vsel %vm227_vm4, %v2605_v40, 0.0 }
 0x305   :  { %2245 = vpow2.f32 %v493_v41  ;;  %501 = vadd.xlane.f32.xlu0 %v500_v50  ;;  %v506_v51 = vsel %vm227_vm4, %v2607_v49, 0.0  ;;  %v491_v61 = vmul.f32 1.442695, %v478_v58 }
 0x306   :  { %507 = vadd.xlane.f32.xlu2 %v506_v51  ;;  %2247 = vpow2.f32 %v489_v52 }
 0x308   :  { %v472_v54 = vpop.xlane.xlu0 %471 }
 0x309   :  { %v480_v55 = vsub.f32 %v448_v16, %v472_v54 }
 0x30b   :  { %v2613_v56 = vpop.eup %2245  ;;  %v495_v59 = vmul.f32 1.442695, %v480_v55 }
 0x30c   :  { %v515_v60 = vsel %vm227_vm4, %v2613_v56, 0.0  ;;  %v2617_v62 = vpop.eup %2247 }
 0x30d   :  { %2249 = vpow2.f32 %v495_v59  ;;  %516 = vadd.xlane.f32.xlu1 %v515_v60  ;;  %v509_v0 = vsel %vm227_vm4, %v2617_v62, 0.0 }
 0x30e   :  { %2251 = vpow2.f32 %v491_v61 }
 0x313   :  { %v2619_v63 = vpop.eup %2249 }
 0x314   :  { %v518_v1 = vsel %vm227_vm4, %v2619_v63, 0.0  ;;  %v2625_v2 = vpop.eup %2251 }
 0x315   :  { %510 = vadd.xlane.f32.xlu1 %v509_v0  ;;  %519 = vadd.xlane.f32.xlu2 %v518_v1  ;;  %v512_v6 = vsel %vm227_vm4, %v2625_v2, 0.0 }
 0x319   :  { %831 = vrot.lane.b32.xlu0 %v2522_v44, %s2381_s3  ;;  %v2217_v44 = vpack.i.bf16 %v2516_v42, %v2518_v43 }
 0x31b   :  { %v2209_v3 = vpop.permute.xlu0 %2208 }
 0x31c   :  { %v2211_v4 = vunpack.i.h.bf16 %v2209_v3  ;;  %v2210_v5 = vunpack.i.l.bf16 %v2209_v3 }
 0x31d   :  { %513 = vadd.xlane.f32.xlu1 %v512_v6 }
 0x31e   :  { %670 = vmatpush.msra.mxu3 %v2210_v5  ;;  %722 = vmatpush.msra.mxu1 %v2211_v4 }
 0x321   :  { %779 = vrot.lane.b32.xlu0 %v2532_v47, %s2381_s3 }
 0x32d   :  { %2213 = vrot.lane.b32.xlu2 %v2212_v7, %s2381_s3 }
 0x336   :  { %2218 = vrot.lane.b32.xlu1 %v2217_v44, %s2381_s3 }
 0x36b   :  { %v505_v8 = vpop.xlane.xlu0 %504 }
 0x36c   :  { %2253 = vrcp.f32 %v505_v8  ;;  %v560_v13 = vand.u32 2147483648, %v505_v8  ;;  %v558_v15 = vand.u32 2147483647, %v505_v8  ;;  %vm554_vm7 = vweird.f32 %v505_v8 }
 0x36e   :  { %v561_v42 = vor.u32 1.1754944e-38, %v560_v13  ;;  %vm559_vm9 = vcmp.eq.f32.partialorder %v558_v15, 8.507059e+37 }
 0x370   :  { %v499_v9 = vpop.xlane.xlu2 %498 }
 0x371   :  { %2255 = vrcp.f32 %v499_v9  ;;  %v532_v19 = vand.u32 2147483648, %v499_v9  ;;  %v530_v22 = vand.u32 2147483647, %v499_v9  ;;  %vm526_vm11 = vweird.f32 %v499_v9 }
 0x372   :  { %v2254_v10 = vpop.eup %2253 }
 0x373   :  { %v550_v11 = vmul.f32 %v2254_v10, %v505_v8  ;;  %vm555_vm6 = vweird.f32 %v2254_v10  ;;  %v533_v27 = vor.u32 1.1754944e-38, %v532_v19  ;;  %vm531_vm13 = vcmp.eq.f32.partialorder %v530_v22, 8.507059e+37 }
 0x374   :  { %vm556_vm8 = vmor %vm554_vm7, %vm555_vm6 }
 0x375   :  { %v551_v12 = vsub.f32 1.0, %v550_v11 }
 0x377   :  { %v2256_v14 = vpop.eup %2255  ;;  %v552_v47 = vmul.f32 %v2254_v10, %v551_v12 }
 0x378   :  { %v522_v45 = vmul.f32 %v2256_v14, %v499_v9  ;;  %v502_v46 = vpop.xlane.xlu0 %501  ;;  %vm527_vm10 = vweird.f32 %v2256_v14 }
 0x379   :  { %v553_v16 = vadd.f32 %v2254_v10, %v552_v47  ;;  %v508_v17 = vpop.xlane.xlu2 %507  ;;  %2257 = vrcp.f32 %v502_v46  ;;  %vm528_vm12 = vmor %vm526_vm11, %vm527_vm10  ;;  %v546_v48 = vand.u32 2147483648, %v502_v46  ;;  %v544_v52 = vand.u32 2147483647, %v502_v46 }
 0x37a   :  { %v523_v43 = vsub.f32 1.0, %v522_v45  ;;  %2259 = vrcp.f32 %v508_v17  ;;  %v574_v38 = vand.u32 2147483648, %v508_v17  ;;  %v572_v51 = vand.u32 2147483647, %v508_v17 }
 0x37b   :  { %v557_v18 = vsel %vm556_vm8, %v2254_v10, %v553_v16  ;;  %vm540_vm1 = vweird.f32 %v502_v46  ;;  %vm568_vm2 = vweird.f32 %v508_v17  ;;  %v547_v59 = vor.u32 1.1754944e-38, %v546_v48 }
 0x37c   :  { %v562_v20 = vsel %vm559_vm9, %v561_v42, %v557_v18  ;;  %v524_v21 = vmul.f32 %v2256_v14, %v523_v43  ;;  %vm573_vm8 = vcmp.eq.f32.partialorder %v572_v51, 8.507059e+37  ;;  %vm545_vm9 = vcmp.eq.f32.partialorder %v544_v52, 8.507059e+37 }
 0x37d   :  { %v635_v23 = vmul.f32 %v2597_v25, %v562_v20 }
 0x37e   :  { %v525_v24 = vadd.f32 %v2256_v14, %v524_v21 }
 0x37f   :  { %v2258_v26 = vpop.eup %2257  ;;  %643 = vst.msk [vmem:[%s3129_s10 + $0x10] sm:$0xff] %vm227_vm4, %v635_v23  ;;  %2128 = vmatmul.msk.f32.vlgmr.msra.gmra.mxu1 %vm227_vm4, %v635_v23 }
 0x380   :  { %v2260_v28 = vpop.eup %2259  ;;  %v529_v29 = vsel %vm528_vm12, %v2256_v14, %v525_v24  ;;  %v536_v30 = vmul.f32 %v2258_v26, %v502_v46  ;;  %v517_v32 = vpop.xlane.xlu1 %516  ;;  %vm541_vm14 = vweird.f32 %v2258_v26 }
 0x381   :  { %v534_v33 = vsel %vm531_vm13, %v533_v27, %v529_v29  ;;  %v564_v34 = vmul.f32 %v2260_v28, %v508_v17  ;;  %2261 = vrcp.f32 %v517_v32  ;;  %vm569_vm15 = vweird.f32 %v2260_v28  ;;  %vm542_vm6 = vmor %vm540_vm1, %vm541_vm14 }
 0x382   :  { %v537_v25 = vsub.f32 1.0, %v536_v30  ;;  %v633_v37 = vmul.f32 %v2601_v31, %v534_v33  ;;  %vm570_vm7 = vmor %vm568_vm2, %vm569_vm15  ;;  %v575_v31 = vor.u32 1.1754944e-38, %v574_v38  ;;  %v616_v6 = vand.u32 2147483648, %v517_v32 }
 0x383   :  { %v565_v35 = vsub.f32 1.0, %v564_v34  ;;  %v614_v44 = vand.u32 2147483647, %v517_v32  ;;  %vm610_vm11 = vweird.f32 %v517_v32 }
 0x384   :  { %v538_v41 = vmul.f32 %v2258_v26, %v537_v25  ;;  %641 = vst.msk [vmem:[%s3129_s10] sm:$0xff] %vm227_vm4, %v633_v37  ;;  %2126 = vmatmul.msk.f32.vlgmr.msra.gmra.mxu3 %vm227_vm4, %v633_v37  ;;  %v617_v12 = vor.u32 1.1754944e-38, %v616_v6 }
 0x385   :  { %v566_v50 = vmul.f32 %v2260_v28, %v565_v35  ;;  %vm615_vm13 = vcmp.eq.f32.partialorder %v614_v44, 8.507059e+37 }
 0x386   :  { %v539_v53 = vadd.f32 %v2258_v26, %v538_v41 }
 0x387   :  { %v2262_v54 = vpop.eup %2261  ;;  %v567_v55 = vadd.f32 %v2260_v28, %v566_v50 }
 0x388   :  { %v543_v58 = vsel %vm542_vm6, %v2258_v26, %v539_v53  ;;  %v606_v60 = vmul.f32 %v2262_v54, %v517_v32  ;;  %v511_v61 = vpop.xlane.xlu1 %510  ;;  %v2651_v0 = vpop.xlane.xlu2 %519  ;;  %vm611_vm10 = vweird.f32 %v2262_v54 }
 0x389   :  { %v571_v1 = vsel %vm570_vm7, %v2260_v28, %v567_v55  ;;  %2263 = vrcp.f32 %v511_v61  ;;  %v548_v4 = vsel %vm545_vm9, %v547_v59, %v543_v58  ;;  %vm612_vm12 = vmor %vm610_vm11, %vm611_vm10  ;;  %v588_v16 = vand.u32 2147483648, %v511_v61 }
 0x38a   :  { %v576_v3 = vsel %vm573_vm8, %v575_v31, %v571_v1  ;;  %v607_v5 = vsub.f32 1.0, %v606_v60  ;;  %2265 = vrcp.f32 %v2651_v0  ;;  %v2656_v9 = vmul.f32 %v2605_v40, %v548_v4 }
 0x38b   :  { %v636_v8 = vmul.f32 %v2607_v49, %v576_v3  ;;  %v586_v19 = vand.u32 2147483647, %v511_v61  ;;  %vm582_vm15 = vweird.f32 %v511_v61  ;;  %v630_v21 = vand.u32 2147483648, %v2651_v0 }
 0x38c   :  { %v608_v7 = vmul.f32 %v2262_v54, %v607_v5  ;;  %642 = vst.msk [vmem:[%s3129_s10 + $0x8] sm:$0xff] %vm227_vm4, %v2656_v9  ;;  %v628_v24 = vand.u32 2147483647, %v2651_v0  ;;  %v589_v27 = vor.u32 1.1754944e-38, %v588_v16  ;;  %vm624_vm6 = vweird.f32 %v2651_v0 }
 0x38d   :  { %644 = vst.msk [vmem:[%s3129_s10 + $0x18] sm:$0xff] %vm227_vm4, %v636_v8  ;;  %vm587_vm7 = vcmp.eq.f32.partialorder %v586_v19, 8.507059e+37  ;;  %v631_v33 = vor.u32 1.1754944e-38, %v630_v21 }
 0x38e   :  { %v609_v10 = vadd.f32 %v2262_v54, %v608_v7  ;;  %vm629_vm9 = vcmp.eq.f32.partialorder %v628_v24, 8.507059e+37 }
 0x38f   :  { %v2264_v11 = vpop.eup %2263 }
 0x390   :  { %v613_v49 = vsel %vm612_vm12, %v2262_v54, %v609_v10  ;;  %v578_v40 = vmul.f32 %v2264_v11, %v511_v61  ;;  %v514_v13 = vpop.xlane.xlu1 %513  ;;  %v2214_v14 = vpop.permute.xlu2 %2213  ;;  %vm583_vm14 = vweird.f32 %v2264_v11  ;;  %v2702_v61 = vld [vmem:[%s3123_s4] sm:$0xff] }
 0x391   :  { %v2266_v47 = vpop.eup %2265  ;;  %v618_v15 = vsel %vm615_vm13, %v617_v12, %v613_v49  ;;  %2267 = vrcp.f32 %v514_v13  ;;  %v2216_v17 = vunpack.i.h.bf16 %v2214_v14  ;;  %v2215_v42 = vunpack.i.l.bf16 %v2214_v14  ;;  %vm584_vm2 = vmor %vm582_vm15, %vm583_vm14 }
 0x392   :  { %v579_v45 = vsub.f32 1.0, %v578_v40  ;;  %v620_v46 = vmul.f32 %v2266_v47, %v2651_v0  ;;  %v639_v43 = vmul.f32 %v2613_v56, %v618_v15  ;;  %vm625_vm1 = vweird.f32 %v2266_v47  ;;  %v832_v56 = vpop.permute.xlu0 %831 }
 0x393   :  { %748 = vmatpush.msra.mxu2 %v2216_v17  ;;  %774 = vmatpush.msrb.mxu3 %v2215_v42  ;;  %vm626_vm8 = vmor %vm624_vm6, %vm625_vm1  ;;  %v602_v38 = vand.u32 2147483648, %v514_v13  ;;  %v600_v48 = vand.u32 2147483647, %v514_v13  ;;  %vm596_vm11 = vweird.f32 %v514_v13  ;;  %v863_v4 = vperm.slane %v2702_v61, 0 }
 0x394   :  { %v580_v18 = vmul.f32 %v2264_v11, %v579_v45  ;;  %v621_v20 = vsub.f32 1.0, %v620_v46  ;;  %647 = vst.msk [vmem:[%s3129_s10 + $0x30] sm:$0xff] %vm227_vm4, %v639_v43  ;;  %2129 = vmatmul.msk.f32.vlgmr.msra.gmra.mxu2 %vm227_vm4, %v636_v8  ;;  %v2382_v15 = vmov 32.0  }
 0x395   :  { %852 = vmatpush.msrb.mxu2 %v832_v56  ;;  %vm601_vm13 = vcmp.eq.f32.partialorder %v600_v48, 8.507059e+37  ;;  %2269 = vrcp.f32 %v2382_v15  ;;  %v965_v48 = vld [vmem:[%s3125_s6 + $0x20] sm:$0xff] }
 0x396   :  { %v581_v22 = vadd.f32 %v2264_v11, %v580_v18  ;;  %v622_v23 = vmul.f32 %v2266_v47, %v621_v20 }
 0x397   :  { %v2268_v26 = vpop.eup %2267 }
 0x398   :  { %v585_v28 = vsel %vm584_vm2, %v2264_v11, %v581_v22  ;;  %v623_v29 = vadd.f32 %v2266_v47, %v622_v23  ;;  %v592_v30 = vmul.f32 %v2268_v26, %v514_v13  ;;  %vm597_vm10 = vweird.f32 %v2268_v26 }
 0x399   :  { %v590_v32 = vsel %vm587_vm7, %v589_v27, %v585_v28  ;;  %vm598_vm12 = vmor %vm596_vm11, %vm597_vm10  ;;  %v927_v27 = vld [vmem:[%s3124_s5 + $0x10] sm:$0xff]  ;;  %v926_v28 = vld [vmem:[%s3124_s5 + $0x8] sm:$0xff] }
 0x39a   :  { %v627_v34 = vsel %vm626_vm8, %v2266_v47, %v623_v29  ;;  %v593_v25 = vsub.f32 1.0, %v592_v30  ;;  %v637_v35 = vmul.f32 %v2617_v62, %v590_v32  ;;  %v603_v62 = vor.u32 1.1754944e-38, %v602_v38  ;;  %v780_v58 = vpop.permute.xlu0 %779  ;;  %v925_v29 = vld [vmem:[%s3124_s5] sm:$0xff] }
 0x39b   :  { %v632_v37 = vsel %vm629_vm9, %v631_v33, %v627_v34  ;;  %v2270_v45 = vpop.eup %2269  ;;  %v968_v34 = vld [vmem:[%s3125_s6 + $0x38] sm:$0xff] }
 0x39c   :  { %v594_v41 = vmul.f32 %v2268_v26, %v593_v25  ;;  %645 = vst.msk [vmem:[%s3129_s10 + $0x20] sm:$0xff] %vm227_vm4, %v637_v35  ;;  %2130 = vmatmul.msk.f32.vlgmr.msrb.gmra.mxu3 %vm227_vm4, %v637_v35  ;;  %v640_v50 = vmul.f32 %v2619_v63, %v632_v37  ;;  %v875_v46 = vmul.f32 32.0, %v2270_v45  ;;  %vm879_vm14 = vweird.f32 %v2270_v45  ;;  %v967_v25 = vld [vmem:[%s3125_s6 + $0x30] sm:$0xff]  ;;  %v966_v35 = vld [vmem:[%s3125_s6 + $0x28] sm:$0xff] }
 0x39e   :  { %v595_v51 = vadd.f32 %v2268_v26, %v594_v41  ;;  %648 = vst.msk [vmem:[%s3129_s10 + $0x38] sm:$0xff] %vm227_vm4, %v640_v50  ;;  %2133 = vmatmul.msk.f32.vlgmr.msrb.gmra.mxu2 %vm227_vm4, %v640_v50  ;;  %v876_v16 = vsub.f32 1.0, %v875_v46  ;;  %v969_v46 = vperm.slane %v2702_v61, 4 }
 0x3a0   :  { %v599_v52 = vsel %vm598_vm12, %v2268_v26, %v595_v51  ;;  %v928_v26 = vld [vmem:[%s3124_s5 + $0x18] sm:$0xff] }
 0x3a1   :  { %v604_v53 = vsel %vm601_vm13, %v603_v62, %v599_v52  ;;  %948 = vmatpush.msra.mxu3 %v928_v26  ;;  %v964_v62 = vld [vmem:[%s3125_s6 + $0x18] sm:$0xff] }
 0x3a2   :  { %v638_v54 = vmul.f32 %v2625_v2, %v604_v53 }
 0x3a3   :  { %949 = vmatpush.msra.mxu3 %v927_v27 }
 0x3a4   :  { %646 = vst.msk [vmem:[%s3129_s10 + $0x28] sm:$0xff] %vm227_vm4, %v638_v54 }
 0x3a5   :  { %950 = vmatpush.msra.mxu3 %v926_v28 }
 0x3a7   :  { %951 = vmatpush.msra.mxu3 %v925_v29 }
 0x3a8   :  { %v2219_v63 = vpop.permute.xlu1 %2218 }
 0x3a9   :  { %v2221_v55 = vunpack.i.h.bf16 %v2219_v63  ;;  %v2220_v31 = vunpack.i.l.bf16 %v2219_v63 }
 0x3ab   :  { %696 = vmatpush.msrb.mxu0 %v2220_v31  ;;  %826 = vmatpush.msrb.mxu1 %v2221_v55  ;;  %v919_v31 = vperm.slane %v2702_v61, 1 }
 0x3ac   :  { %2127 = vmatmul.msk.f32.vlgmr.msrb.gmra.mxu0 %vm227_vm4, %v2656_v9  ;;  %2132 = vmatmul.msk.f32.vlgmr.msrb.gmra.mxu1 %vm227_vm4, %v639_v43 }
 0x3ad   :  { %800 = vmatpush.msra.mxu0 %v780_v58 }
 0x3af   :  { %984 = vmatpush.msrb.mxu0 %v968_v34  ;;  %v1065_v34 = vld [vmem:[#allocation2 + $0xd8] sm:$0xff] }
 0x3b0   :  { %1134 = vmatpush.msrb.mxu3 %v1065_v34 }
 0x3b1   :  { %985 = vmatpush.msrb.mxu0 %v967_v25  ;;  %v1056_v25 = vld [vmem:[#allocation2 + $0x90] sm:$0xff] }
 0x3b3   :  { %986 = vmatpush.msrb.mxu0 %v966_v35  ;;  %v1060_v35 = vld [vmem:[#allocation2 + $0xb0] sm:$0xff] }
 0x3b4   :  { %2131 = vmatmul.msk.f32.vlgmr.msra.gmra.mxu0 %vm227_vm4, %v638_v54 }
 0x3b5   :  { %987 = vmatpush.msrb.mxu0 %v965_v48  ;;  %v1063_v48 = vld [vmem:[#allocation2 + $0xc8] sm:$0xff] }
 0x3b7   :  { %988 = vmatpush.msrb.mxu0 %v964_v62  ;;  %v1062_v62 = vld [vmem:[#allocation2 + $0xc0] sm:$0xff] }
 0x3fc   :  { %v724_v59 = vpop.f32.mrf.mxu1 }
 0x407   :  { %v672_v2 = vpop.f32.mrf.mxu3 }
 0x408   :  { %v857_v0 = vadd.f32 %v724_v59, %v672_v2 }
 0x417   :  { %v750_v1 = vpop.f32.mrf.mxu2 }
 0x41f   :  { %v776_v60 = vpop.f32.mrf.mxu3 }
 0x420   :  { %v859_v3 = vadd.f32 %v857_v0, %v776_v60  ;;  %v922_v60 = vperm.slane %v2702_v61, 2 }
 0x421   :  { %v854_v49 = vpop.f32.mrf.mxu2 }
 0x429   :  { %v698_v5 = vpop.f32.mrf.mxu0  ;;  %v828_v6 = vpop.f32.mrf.mxu1 }
 0x42a   :  { %v861_v7 = vadd.f32 %v859_v3, %v828_v6  ;;  %v858_v9 = vadd.f32 %v750_v1, %v698_v5 }
 0x42c   :  { %v864_v44 = vadd.f32 %v863_v4, %v861_v7 }
 0x42e   :  { %v866_v8 = vadd.f32 %v864_v44, %v2485_v36  ;;  %v877_v36 = vmul.f32 %v2270_v45, %v876_v16 }
 0x430   :  { %v868_v10 = vsel %vm125_vm3, %v866_v8, 0.0  ;;  %v878_v17 = vadd.f32 %v2270_v45, %v877_v36 }
 0x431   :  { %v802_v11 = vpop.f32.mrf.mxu0  ;;  %869 = vadd.xlane.f32.xlu2 %v868_v10  ;;  %v963_v10 = vld [vmem:[%s3125_s6 + $0x10] sm:$0xff] }
 0x432   :  { %v860_v12 = vadd.f32 %v858_v9, %v802_v11  ;;  %v2709_v42 = vsel %vm879_vm14, %v2270_v45, %v878_v17  ;;  %989 = vmatpush.msrb.mxu0 %v963_v10  ;;  %v962_v11 = vld [vmem:[%s3125_s6 + $0x8] sm:$0xff] }
 0x434   :  { %v862_v40 = vadd.f32 %v860_v12, %v854_v49  ;;  %v961_v12 = vld [vmem:[%s3125_s6] sm:$0xff]  ;;  %990 = vmatpush.msrb.mxu0 %v962_v11  ;;  %v929_v49 = vperm.slane %v2702_v61, 3  ;;  %v1048_v11 = vperm.slane %v2702_v61, 6 }
 0x436   :  { %v865_v13 = vadd.f32 %v863_v4, %v862_v40  ;;  %991 = vmatpush.msrb.mxu0 %v961_v12 }
 0x438   :  { %v867_v14 = vadd.f32 %v865_v13, %v2496_v39 }
 0x43a   :  { %v871_v47 = vsel %vm125_vm3, %v867_v14, 0.0 }
 0x43b   :  { %872 = vadd.xlane.f32.xlu1 %v871_v47 }
 0x4a4   :  { %v870_v43 = vpop.xlane.xlu2 %869 }
 0x4a5   :  { %v881_v18 = vmul.f32 %v2709_v42, %v870_v43 }
 0x4a7   :  { %v883_v19 = vsub.f32 %v866_v8, %v881_v18 }
 0x4a9   :  { %v885_v20 = vmul.f32 %v883_v19, %v883_v19 }
 0x4ab   :  { %v887_v39 = vsel %vm125_vm3, %v885_v20, 0.0 }
 0x4ac   :  { %888 = vadd.xlane.f32.xlu0 %v887_v39 }
 0x4ae   :  { %v873_v21 = vpop.xlane.xlu1 %872 }
 0x4af   :  { %v882_v22 = vmul.f32 %v2709_v42, %v873_v21 }
 0x4b1   :  { %v884_v23 = vsub.f32 %v867_v14, %v882_v22 }
 0x4b3   :  { %v886_v24 = vmul.f32 %v884_v23, %v884_v23 }
 0x4b5   :  { %v890_v56 = vsel %vm125_vm3, %v886_v24, 0.0 }
 0x4b6   :  { %891 = vadd.xlane.f32.xlu2 %v890_v56 }
 0x51f   :  { %v889_v30 = vpop.xlane.xlu0 %888 }
 0x520   :  { %v893_v32 = vmul.f32 %v889_v30, %v2709_v42 }
 0x522   :  { %v895_v33 = vadd.f32 1e-05, %v893_v32  ;;  %v1057_v32 = vld [vmem:[#allocation2 + $0x98] sm:$0xff] }
 0x523   :  { %1088 = vmatpush.msra.mxu1 %v1057_v32 }
 0x524   :  { %2271 = vrsqrt.f32 %v895_v33  ;;  %vm903_vm1 = vweird.f32 %v895_v33 }
 0x525   :  { %1089 = vmatpush.msra.mxu1 %v1056_v25 }
 0x529   :  { %v892_v37 = vpop.xlane.xlu2 %891 }
 0x52a   :  { %v2272_v38 = vpop.eup %2271  ;;  %v894_v41 = vmul.f32 %v892_v37, %v2709_v42  ;;  %v1064_v37 = vld [vmem:[#allocation2 + $0xd0] sm:$0xff] }
 0x52b   :  { %v898_v50 = vmul.f32 %v2272_v38, %v895_v33  ;;  %vm904_vm15 = vweird.f32 %v2272_v38  ;;  %v1061_v33 = vld [vmem:[#allocation2 + $0xb8] sm:$0xff]  ;;  %1135 = vmatpush.msrb.mxu3 %v1064_v37 }
 0x52c   :  { %v896_v51 = vadd.f32 1e-05, %v894_v41  ;;  %vm905_vm2 = vmor %vm903_vm1, %vm904_vm15  ;;  %1111 = vmatpush.msra.mxu2 %v1061_v33  ;;  %v1059_v41 = vld [vmem:[#allocation2 + $0xa8] sm:$0xff] }
 0x52d   :  { %v899_v52 = vmul.f32 %v2272_v38, %v898_v50  ;;  %1136 = vmatpush.msrb.mxu3 %v1063_v48  ;;  %v1054_v50 = vld [vmem:[#allocation2 + $0x80] sm:$0xff] }
 0x52e   :  { %2273 = vrsqrt.f32 %v896_v51  ;;  %vm913_vm7 = vweird.f32 %v896_v51  ;;  %1112 = vmatpush.msra.mxu2 %v1060_v35 }
 0x52f   :  { %v900_v53 = vmul.f32 0.5, %v899_v52  ;;  %1137 = vmatpush.msrb.mxu3 %v1062_v62 }
 0x530   :  { %1113 = vmatpush.msra.mxu2 %v1059_v41 }
 0x531   :  { %v901_v54 = vsub.f32 1.5, %v900_v53 }
 0x533   :  { %v902_v63 = vmul.f32 %v2272_v38, %v901_v54 }
 0x534   :  { %v2274_v55 = vpop.eup %2273 }
 0x535   :  { %v906_v58 = vsel %vm905_vm2, %v2272_v38, %v902_v63  ;;  %v908_v2 = vmul.f32 %v2274_v55, %v896_v51  ;;  %vm914_vm6 = vweird.f32 %v2274_v55  ;;  %v1055_v38 = vld [vmem:[#allocation2 + $0x88] sm:$0xff]  ;;  %v1058_v51 = vld [vmem:[#allocation2 + $0xa0] sm:$0xff]  ;;  %v1069_v63 = vld [vmem:[#allocation2 + $0xf8] sm:$0xff] }
 0x536   :  { %v917_v59 = vmul.f32 %v906_v58, %v883_v19  ;;  %vm915_vm8 = vmor %vm913_vm7, %vm914_vm6  ;;  %1090 = vmatpush.msra.mxu1 %v1055_v38  ;;  %1114 = vmatpush.msra.mxu2 %v1058_v51  ;;  %v1067_v58 = vld [vmem:[#allocation2 + $0xe8] sm:$0xff] }
 0x537   :  { %v909_v0 = vmul.f32 %v2274_v55, %v908_v2 }
 0x538   :  { %v920_v1 = vmul.f32 %v919_v31, %v917_v59  ;;  %1091 = vmatpush.msra.mxu1 %v1054_v50 }
 0x539   :  { %v910_v3 = vmul.f32 0.5, %v909_v0  ;;  %v1066_v0 = vld [vmem:[#allocation2 + $0xe0] sm:$0xff] }
 0x53a   :  { %v923_v4 = vadd.f32 %v922_v60, %v920_v1  ;;  %1157 = vmatpush.msrb.mxu1 %v1069_v63 }
 0x53b   :  { %v911_v5 = vsub.f32 1.5, %v910_v3 }
 0x53c   :  { %2134 = vmatmul.msk.f32.vlgmr.msra.gmra.mxu3 %vm125_vm3, %v923_v4 }
 0x53d   :  { %v912_v6 = vmul.f32 %v2274_v55, %v911_v5 }
 0x53f   :  { %v916_v7 = vsel %vm915_vm8, %v2274_v55, %v912_v6  ;;  %v1068_v55 = vld [vmem:[#allocation2 + $0xf0] sm:$0xff] }
 0x540   :  { %v918_v44 = vmul.f32 %v916_v7, %v884_v23  ;;  %1158 = vmatpush.msrb.mxu1 %v1068_v55 }
 0x542   :  { %v921_v8 = vmul.f32 %v919_v31, %v918_v44  ;;  %1159 = vmatpush.msrb.mxu1 %v1067_v58  ;;  %v1045_v44 = vperm.slane %v2702_v61, 5 }
 0x544   :  { %v924_v9 = vadd.f32 %v922_v60, %v921_v8  ;;  %1160 = vmatpush.msrb.mxu1 %v1066_v0 }
 0x546   :  { %2135 = vmatmul.msk.f32.gmra.mxu3 %vm125_vm3, %v924_v9 }
 0x5bf   :  { %v953_v40 = vpop.f32.mrf.mxu3 }
 0x5c0   :  { %v954_v13 = vadd.f32 %v953_v40, %v929_v49 }
 0x5c2   :  { %v959_v14 = vmax.f32 %v954_v13, 0.0 }
 0x5c4   :  { %2136 = vmatmul.msk.f32.vlgmr.msrb.gmra.mxu0 %vm78_vm0, %v959_v14 }
 0x5c9   :  { %v956_v47 = vpop.f32.mrf.mxu3 }
 0x5ca   :  { %v957_v15 = vadd.f32 %v956_v47, %v929_v49 }
 0x5cc   :  { %v960_v45 = vmax.f32 %v957_v15, 0.0 }
 0x5ce   :  { %2137 = vmatmul.msk.f32.gmra.mxu0 %vm78_vm0, %v960_v45 }
 0x641   :  { %v993_v16 = vpop.f32.mrf.mxu0 }
 0x642   :  { %v994_v36 = vadd.f32 %v993_v16, %v969_v46 }
 0x644   :  { %v999_v17 = vadd.f32 %v994_v36, %v923_v4 }
 0x646   :  { %v1001_v43 = vsel %vm125_vm3, %v999_v17, 0.0 }
 0x647   :  { %1002 = vadd.xlane.f32.xlu1 %v1001_v43 }
 0x64b   :  { %v996_v18 = vpop.f32.mrf.mxu0 }
 0x64c   :  { %v997_v19 = vadd.f32 %v996_v18, %v969_v46 }
 0x64e   :  { %v1000_v20 = vadd.f32 %v997_v19, %v924_v9 }
 0x650   :  { %v1004_v39 = vsel %vm125_vm3, %v1000_v20, 0.0 }
 0x651   :  { %1005 = vadd.xlane.f32.xlu0 %v1004_v39 }
 0x6ba   :  { %v1003_v21 = vpop.xlane.xlu1 %1002 }
 0x6bb   :  { %v1007_v22 = vmul.f32 %v1003_v21, %v2709_v42 }
 0x6bd   :  { %v2764_v23 = vsub.f32 %v999_v17, %v1007_v22 }
 0x6bf   :  { %v1011_v24 = vmul.f32 %v2764_v23, %v2764_v23 }
 0x6c1   :  { %v1013_v56 = vsel %vm125_vm3, %v1011_v24, 0.0 }
 0x6c2   :  { %1014 = vadd.xlane.f32.xlu2 %v1013_v56 }
 0x6c4   :  { %v1006_v26 = vpop.xlane.xlu0 %1005 }
 0x6c5   :  { %v1008_v27 = vmul.f32 %v1006_v26, %v2709_v42 }
 0x6c7   :  { %v2770_v28 = vsub.f32 %v1000_v20, %v1008_v27 }
 0x6c9   :  { %v1012_v29 = vmul.f32 %v2770_v28, %v2770_v28 }
 0x6cb   :  { %v1016_v30 = vsel %vm125_vm3, %v1012_v29, 0.0 }
 0x6cc   :  { %1017 = vadd.xlane.f32.xlu1 %v1016_v30 }
 0x735   :  { %v1015_v52 = vpop.xlane.xlu2 %1014 }
 0x736   :  { %v1019_v53 = vmul.f32 %v1015_v52, %v2709_v42 }
 0x738   :  { %v1021_v54 = vadd.f32 1e-05, %v1019_v53 }
 0x73a   :  { %2275 = vrsqrt.f32 %v1021_v54  ;;  %vm1029_vm10 = vweird.f32 %v1021_v54 }
 0x73f   :  { %v1018_v31 = vpop.xlane.xlu1 %1017 }
 0x740   :  { %v2276_v2 = vpop.eup %2275  ;;  %v1020_v59 = vmul.f32 %v1018_v31, %v2709_v42 }
 0x741   :  { %v1024_v60 = vmul.f32 %v2276_v2, %v1021_v54  ;;  %vm1030_vm9 = vweird.f32 %v2276_v2 }
 0x742   :  { %v1022_v1 = vadd.f32 1e-05, %v1020_v59  ;;  %vm1031_vm11 = vmor %vm1029_vm10, %vm1030_vm9 }
 0x743   :  { %v1025_v3 = vmul.f32 %v2276_v2, %v1024_v60 }
 0x744   :  { %2277 = vrsqrt.f32 %v1022_v1  ;;  %vm1039_vm13 = vweird.f32 %v1022_v1 }
 0x745   :  { %v1026_v4 = vmul.f32 0.5, %v1025_v3 }
 0x747   :  { %v1027_v5 = vsub.f32 1.5, %v1026_v4 }
 0x749   :  { %v1028_v6 = vmul.f32 %v2276_v2, %v1027_v5 }
 0x74a   :  { %v2278_v7 = vpop.eup %2277 }
 0x74b   :  { %v1032_v8 = vsel %vm1031_vm11, %v2276_v2, %v1028_v6  ;;  %v1034_v9 = vmul.f32 %v2278_v7, %v1022_v1  ;;  %vm1040_vm12 = vweird.f32 %v2278_v7 }
 0x74c   :  { %v1043_v10 = vmul.f32 %v1032_v8, %v2764_v23  ;;  %vm1041_vm14 = vmor %vm1039_vm13, %vm1040_vm12 }
 0x74d   :  { %v1035_v12 = vmul.f32 %v2278_v7, %v1034_v9 }
 0x74e   :  { %v1046_v49 = vmul.f32 %v1045_v44, %v1043_v10 }
 0x74f   :  { %v1036_v40 = vmul.f32 0.5, %v1035_v12 }
 0x750   :  { %v2780_v13 = vadd.f32 %v1048_v11, %v1046_v49 }
 0x751   :  { %v1037_v14 = vsub.f32 1.5, %v1036_v40 }
 0x752   :  { %2139 = vmatmul.msk.f32.vlgmr.msra.gmra.mxu1 %vm125_vm3, %v2780_v13  ;;  %2141 = vmatmul.msk.f32.vlgmr.msra.gmra.mxu2 %vm125_vm3, %v2780_v13 }
 0x753   :  { %v1038_v47 = vmul.f32 %v2278_v7, %v1037_v14  ;;  %2143 = vmatmul.msk.f32.vlgmr.msrb.gmra.mxu3 %vm125_vm3, %v2780_v13 }
 0x755   :  { %v1042_v61 = vsel %vm1041_vm14, %v2278_v7, %v1038_v47 }
 0x756   :  { %v1044_v15 = vmul.f32 %v1042_v61, %v2770_v28 }
 0x758   :  { %v1047_v45 = vmul.f32 %v1045_v44, %v1044_v15 }
 0x75a   :  { %v2789_v46 = vadd.f32 %v1048_v11, %v1047_v45 }
 0x75c   :  { %2140 = vmatmul.msk.f32.gmra.mxu1 %vm125_vm3, %v2789_v46  ;;  %2142 = vmatmul.msk.f32.gmra.mxu2 %vm125_vm3, %v2789_v46 }
 0x75d   :  { %2144 = vmatmul.msk.f32.gmra.mxu3 %vm125_vm3, %v2789_v46 }
 0x764   :  { %2145 = vmatmul.msk.f32.vlgmr.msrb.gmra.mxu1 %vm125_vm3, %v2780_v13 }
 0x76c   :  { %2146 = vmatmul.msk.f32.gmra.mxu1 %vm125_vm3, %v2789_v46 }
 0x7cf   :  { %v2801_v16 = vpop.f32.mrf.mxu1 }
 0x7d0   :  { %1169 = vrot.lane.b32.xlu0 %v2801_v16, %s2380_s2 }
 0x7d5   :  { %v2805_v36 = vpop.f32.mrf.mxu2 }
 0x7d6   :  { %1223 = vrot.lane.b32.xlu2 %v2805_v36, %s2380_s2  ;;  %v2811_v43 = vpop.f32.mrf.mxu3  ;;  %v2222_v0 = vpack.i.bf16 %v2801_v16, %v2805_v36 }
 0x7d9   :  { %v2809_v17 = vpop.f32.mrf.mxu1 }
 0x7de   :  { %1196 = vrot.lane.b32.xlu2 %v2809_v17, %s2380_s2 }
 0x7df   :  { %v2815_v18 = vpop.f32.mrf.mxu2 }
 0x7e0   :  { %1250 = vrot.lane.b32.xlu1 %v2815_v18, %s2380_s2  ;;  %v2823_v20 = vpop.f32.mrf.mxu3 }
 0x7e1   :  { %v2819_v19 = vpop.f32.mrf.mxu1 }
 0x7e2   :  { %1331 = vrot.lane.b32.xlu0 %v2819_v19, %s2380_s2 }
 0x7e6   :  { %1304 = vrot.lane.b32.xlu2 %v2823_v20, %s2380_s2 }
 0x7e8   :  { %1277 = vrot.lane.b32.xlu1 %v2811_v43, %s2380_s2 }
 0x7e9   :  { %v2829_v39 = vpop.f32.mrf.mxu1 }
 0x7ea   :  { %1358 = vrot.lane.b32.xlu0 %v2829_v39, %s2380_s2 }
 0x830   :  { %v1224_v21 = vpop.permute.xlu2 %1223 }
 0x838   :  { %v1197_v22 = vpop.permute.xlu2 %1196 }
 0x839   :  { %2149 = vmatpush.xpose.msk.msra.mxu0 %vm227_vm4, %v1197_v22 }
 0x83c   :  { %2150 = vmatmul.msk.f32.vlgmr.msra.gmra.mxu0 %vm227_vm4, %v2809_v17 }
 0x840   :  { %v1305_v23 = vpop.permute.xlu2 %1304 }
 0x841   :  { %2157 = vmatpush.xpose.msk.msra.mxu1 %vm227_vm4, %v1305_v23 }
 0x842   :  { %v1170_v24 = vpop.permute.xlu0 %1169 }
 0x843   :  { %2147 = vmatpush.xpose.msk.msrb.mxu2 %vm227_vm4, %v1170_v24 }
 0x844   :  { %2158 = vmatmul.msk.f32.vlgmr.msra.gmra.mxu1 %vm227_vm4, %v2823_v20 }
 0x846   :  { %2148 = vmatmul.msk.f32.vlgmr.msrb.gmra.mxu2 %vm227_vm4, %v2801_v16 }
 0x847   :  { %2151 = vmatpush.xpose.msk.msra.mxu2 %vm227_vm4, %v1224_v21 }
 0x84e   :  { %2152 = vmatmul.msk.f32.vlgmr.msra.gmra.mxu2 %vm227_vm4, %v2805_v36 }
 0x852   :  { %v1251_v56 = vpop.permute.xlu1 %1250 }
 0x853   :  { %2153 = vmatpush.xpose.msk.msra.mxu3 %vm227_vm4, %v1251_v56 }
 0x854   :  { %v1332_v26 = vpop.permute.xlu0 %1331 }
 0x855   :  { %2159 = vmatpush.xpose.msk.msrb.mxu2 %vm227_vm4, %v1332_v26 }
 0x856   :  { %2154 = vmatmul.msk.f32.vlgmr.msra.gmra.mxu3 %vm227_vm4, %v2815_v18 }
 0x858   :  { %2160 = vmatmul.msk.f32.vlgmr.msrb.gmra.mxu2 %vm227_vm4, %v2819_v19 }
 0x85a   :  { %v1278_v27 = vpop.permute.xlu1 %1277 }
 0x85b   :  { %2155 = vmatpush.xpose.msk.msrb.mxu0 %vm227_vm4, %v1278_v27 }
 0x85c   :  { %v1359_v28 = vpop.permute.xlu0 %1358 }
 0x85d   :  { %2161 = vmatpush.xpose.msk.msrb.mxu3 %vm227_vm4, %v1359_v28 }
 0x85e   :  { %2156 = vmatmul.msk.f32.vlgmr.msrb.gmra.mxu0 %vm227_vm4, %v2811_v43 }
 0x860   :  { %2162 = vmatmul.msk.f32.vlgmr.msrb.gmra.mxu3 %vm227_vm4, %v2829_v39 }
 0x8b9   :  { %v1219_v33 = vpop.f32.mrf.mxu0 }
 0x8ba   :  { %v1385_v34 = vsel %vm2566_vm5, %v1219_v33, -1e+09 }
 0x8bb   :  { %v1395_v37 = vsel %vm227_vm4, %v1385_v34, -inf }
 0x8c1   :  { %v1327_v41 = vpop.f32.mrf.mxu1 }
 0x8c2   :  { %v1389_v48 = vsel %vm2566_vm5, %v1327_v41, -1e+09 }
 0x8c3   :  { %v1407_v53 = vsel %vm227_vm4, %v1389_v48, -inf }
 0x8c9   :  { %v1192_v29 = vpop.f32.mrf.mxu2 }
 0x8ca   :  { %v1384_v30 = vsel %vm2566_vm5, %v1192_v29, -1e+09 }
 0x8cb   :  { %v1392_v32 = vsel %vm227_vm4, %v1384_v30, -inf }
 0x8cc   :  { %1393 = vmax.xlane.f32.xlu1 %v1392_v32 }
 0x8d1   :  { %v1246_v25 = vpop.f32.mrf.mxu2 }
 0x8d2   :  { %v1386_v35 = vsel %vm2566_vm5, %v1246_v25, -1e+09 }
 0x8d3   :  { %v1398_v38 = vsel %vm227_vm4, %v1386_v35, -inf }
 0x8d4   :  { %1396 = vmax.xlane.f32.xlu1 %v1395_v37  ;;  %1399 = vmax.xlane.f32.xlu0 %v1398_v38 }
 0x8d9   :  { %v1273_v50 = vpop.f32.mrf.mxu3 }
 0x8da   :  { %v2870_v51 = vsel %vm2566_vm5, %v1273_v50, -1e+09 }
 0x8db   :  { %v1354_v62 = vpop.f32.mrf.mxu2  ;;  %v1401_v52 = vsel %vm227_vm4, %v2870_v51, -inf  ;;  %v1300_v63 = vpop.f32.mrf.mxu0 }
 0x8dc   :  { %v1390_v54 = vsel %vm2566_vm5, %v1354_v62, -1e+09  ;;  %1402 = vmax.xlane.f32.xlu2 %v1401_v52  ;;  %1408 = vmax.xlane.f32.xlu1 %v1407_v53  ;;  %v1388_v31 = vsel %vm2566_vm5, %v1300_v63, -1e+09  ;;  %v2227_v62 = vpack.i.bf16 %v2819_v19, %v2815_v18 }
 0x8dd   :  { %v1410_v55 = vsel %vm227_vm4, %v1390_v54, -inf  ;;  %v1404_v2 = vsel %vm227_vm4, %v1388_v31, -inf }
 0x8de   :  { %1411 = vmax.xlane.f32.xlu0 %v1410_v55 }
 0x8e3   :  { %v1381_v58 = vpop.f32.mrf.mxu3 }
 0x8e4   :  { %v1391_v59 = vsel %vm2566_vm5, %v1381_v58, -1e+09  ;;  %1405 = vmax.xlane.f32.xlu2 %v1404_v2 }
 0x8e5   :  { %v1413_v60 = vsel %vm227_vm4, %v1391_v59, -inf }
 0x8e6   :  { %1414 = vmax.xlane.f32.xlu0 %v1413_v60 }
 0x8fa   :  { %2223 = vrot.lane.b32.xlu0 %v2222_v0, %s2381_s3 }
 0x93f   :  { %v1394_v1 = vpop.xlane.xlu1 %1393 }
 0x940   :  { %v1416_v3 = vsub.f32 %v1384_v30, %v1394_v1 }
 0x942   :  { %v1424_v4 = vmul.f32 1.442695, %v1416_v3 }
 0x944   :  { %2279 = vpow2.f32 %v1424_v4 }
 0x947   :  { %v1397_v5 = vpop.xlane.xlu1 %1396  ;;  %v1400_v6 = vpop.xlane.xlu0 %1399 }
 0x948   :  { %v1417_v7 = vsub.f32 %v1385_v34, %v1397_v5  ;;  %v1418_v44 = vsub.f32 %v1386_v35, %v1400_v6 }
 0x94a   :  { %v2887_v8 = vpop.eup %2279  ;;  %v1426_v57 = vmul.f32 1.442695, %v1417_v7  ;;  %v1428_v9 = vmul.f32 1.442695, %v1418_v44 }
 0x94b   :  { %v1440_v10 = vsel %vm227_vm4, %v2887_v8, 0.0 }
 0x94c   :  { %2281 = vpow2.f32 %v1426_v57  ;;  %1441 = vadd.xlane.f32.xlu0 %v1440_v10 }
 0x94d   :  { %2283 = vpow2.f32 %v1428_v9 }
 0x94f   :  { %v1403_v11 = vpop.xlane.xlu2 %1402  ;;  %v1409_v12 = vpop.xlane.xlu1 %1408 }
 0x950   :  { %v1421_v49 = vsub.f32 %v1389_v48, %v1409_v12  ;;  %v1419_v27 = vsub.f32 %v2870_v51, %v1403_v11 }
 0x951   :  { %v1412_v40 = vpop.xlane.xlu0 %1411 }
 0x952   :  { %v2891_v14 = vpop.eup %2281  ;;  %v1434_v47 = vmul.f32 1.442695, %v1421_v49  ;;  %v1422_v61 = vsub.f32 %v1390_v54, %v1412_v40  ;;  %v1430_v33 = vmul.f32 1.442695, %v1419_v27 }
 0x953   :  { %v2893_v15 = vpop.eup %2283  ;;  %v1443_v45 = vsel %vm227_vm4, %v2891_v14, 0.0 }
 0x954   :  { %v1436_v16 = vmul.f32 1.442695, %v1422_v61  ;;  %1444 = vadd.xlane.f32.xlu0 %v1443_v45  ;;  %v1446_v36 = vsel %vm227_vm4, %v2893_v15, 0.0  ;;  %2285 = vpow2.f32 %v1434_v47 }
 0x955   :  { %1447 = vadd.xlane.f32.xlu2 %v1446_v36 }
 0x956   :  { %2287 = vpow2.f32 %v1436_v16 }
 0x957   :  { %v1406_v21 = vpop.xlane.xlu2 %1405 }
 0x958   :  { %v1420_v22 = vsub.f32 %v1388_v31, %v1406_v21 }
 0x959   :  { %v1415_v23 = vpop.xlane.xlu0 %1414 }
 0x95a   :  { %v1432_v24 = vmul.f32 1.442695, %v1420_v22  ;;  %v1423_v56 = vsub.f32 %v1391_v59, %v1415_v23  ;;  %v2899_v26 = vpop.eup %2285 }
 0x95b   :  { %v1455_v30 = vsel %vm227_vm4, %v2899_v26, 0.0 }
 0x95c   :  { %v2902_v28 = vpop.eup %2287  ;;  %2289 = vpow2.f32 %v1432_v24  ;;  %v1438_v29 = vmul.f32 1.442695, %v1423_v56  ;;  %1456 = vadd.xlane.f32.xlu1 %v1455_v30 }
 0x95d   :  { %v1458_v32 = vsel %vm227_vm4, %v2902_v28, 0.0 }
 0x95e   :  { %2291 = vpow2.f32 %v1438_v29  ;;  %1459 = vadd.xlane.f32.xlu2 %v1458_v32 }
 0x95f   :  { %2293 = vpow2.f32 %v1430_v33 }
 0x962   :  { %v2908_v34 = vpop.eup %2289 }
 0x963   :  { %v1452_v25 = vsel %vm227_vm4, %v2908_v34, 0.0 }
 0x964   :  { %v2912_v35 = vpop.eup %2291  ;;  %1453 = vadd.xlane.f32.xlu1 %v1452_v25 }
 0x965   :  { %v1461_v37 = vsel %vm227_vm4, %v2912_v35, 0.0  ;;  %v2918_v38 = vpop.eup %2293 }
 0x966   :  { %1462 = vadd.xlane.f32.xlu2 %v1461_v37  ;;  %v1449_v48 = vsel %vm227_vm4, %v2918_v38, 0.0 }
 0x968   :  { %1775 = vrot.lane.b32.xlu0 %v2829_v39, %s2381_s3  ;;  %v2232_v39 = vpack.i.bf16 %v2811_v43, %v2809_v17 }
 0x96c   :  { %v2224_v41 = vpop.permute.xlu0 %2223  ;;  %1450 = vadd.xlane.f32.xlu1 %v1449_v48 }
 0x96d   :  { %v2226_v50 = vunpack.i.h.bf16 %v2224_v41  ;;  %v2225_v51 = vunpack.i.l.bf16 %v2224_v41 }
 0x96f   :  { %1614 = vmatpush.msra.mxu0 %v2226_v50  ;;  %1666 = vmatpush.msra.mxu2 %v2225_v51 }
 0x970   :  { %1723 = vrot.lane.b32.xlu0 %v2823_v20, %s2381_s3 }
 0x97e   :  { %2228 = vrot.lane.b32.xlu2 %v2227_v62, %s2381_s3 }
 0x985   :  { %2233 = vrot.lane.b32.xlu1 %v2232_v39, %s2381_s3 }
 0x9bf   :  { %v1442_v52 = vpop.xlane.xlu0 %1441 }
 0x9c0   :  { %2295 = vrcp.f32 %v1442_v52  ;;  %v1475_v58 = vand.u32 2147483648, %v1442_v52  ;;  %v1473_v18 = vand.u32 2147483647, %v1442_v52  ;;  %vm1469_vm15 = vweird.f32 %v1442_v52 }
 0x9c2   :  { %v1476_v59 = vor.u32 1.1754944e-38, %v1475_v58  ;;  %vm1474_vm2 = vcmp.eq.f32.partialorder %v1473_v18, 8.507059e+37 }
 0x9c6   :  { %v2296_v53 = vpop.eup %2295 }
 0x9c7   :  { %v1465_v54 = vmul.f32 %v2296_v53, %v1442_v52  ;;  %v1445_v63 = vpop.xlane.xlu0 %1444  ;;  %vm1470_vm5 = vweird.f32 %v2296_v53 }
 0x9c8   :  { %v1448_v55 = vpop.xlane.xlu2 %1447  ;;  %2297 = vrcp.f32 %v1445_v63  ;;  %vm1471_vm1 = vmor %vm1469_vm15, %vm1470_vm5  ;;  %v1489_v44 = vand.u32 2147483648, %v1445_v63  ;;  %vm1483_vm8 = vweird.f32 %v1445_v63  ;;  %v1487_v49 = vand.u32 2147483647, %v1445_v63 }
 0x9c9   :  { %v1466_v31 = vsub.f32 1.0, %v1465_v54  ;;  %2299 = vrcp.f32 %v1448_v55  ;;  %v1503_v9 = vand.u32 2147483648, %v1448_v55  ;;  %v1501_v11 = vand.u32 2147483647, %v1448_v55 }
 0x9ca   :  { %vm1497_vm9 = vweird.f32 %v1448_v55  ;;  %v1490_v21 = vor.u32 1.1754944e-38, %v1489_v44  ;;  %vm1488_vm13 = vcmp.eq.f32.partialorder %v1487_v49, 8.507059e+37 }
 0x9cb   :  { %v1467_v20 = vmul.f32 %v2296_v53, %v1466_v31  ;;  %v1504_v36 = vor.u32 1.1754944e-38, %v1503_v9  ;;  %vm1502_vm12 = vcmp.eq.f32.partialorder %v1501_v11, 8.507059e+37 }
 0x9cd   :  { %v1468_v19 = vadd.f32 %v2296_v53, %v1467_v20 }
 0x9ce   :  { %v2298_v2 = vpop.eup %2297 }
 0x9cf   :  { %v2300_v17 = vpop.eup %2299  ;;  %v1472_v43 = vsel %vm1471_vm1, %v2296_v53, %v1468_v19  ;;  %v1479_v60 = vmul.f32 %v2298_v2, %v1445_v63  ;;  %v2930_v1 = vpop.xlane.xlu1 %1456  ;;  %vm1484_vm6 = vweird.f32 %v2298_v2 }
 0x9d0   :  { %v1493_v0 = vmul.f32 %v2300_v17, %v1448_v55  ;;  %v1477_v3 = vsel %vm1474_vm2, %v1476_v59, %v1472_v43  ;;  %2301 = vrcp.f32 %v2930_v1  ;;  %vm1498_vm7 = vweird.f32 %v2300_v17  ;;  %vm2937_vm10 = vmor %vm1483_vm8, %vm1484_vm6 }
 0x9d1   :  { %v1480_v4 = vsub.f32 1.0, %v1479_v60  ;;  %v2933_v5 = vpop.xlane.xlu2 %1459  ;;  %v1576_v10 = vmul.f32 %v2887_v8, %v1477_v3  ;;  %vm1499_vm11 = vmor %vm1497_vm9, %vm1498_vm7  ;;  %v1543_v32 = vand.u32 2147483647, %v2930_v1  ;;  %v1545_v33 = vand.u32 2147483648, %v2930_v1 }
 0x9d2   :  { %v1494_v6 = vsub.f32 1.0, %v1493_v0  ;;  %2303 = vrcp.f32 %v2933_v5  ;;  %v1557_v41 = vand.u32 2147483647, %v2933_v5  ;;  %v1559_v48 = vand.u32 2147483648, %v2933_v5 }
 0x9d3   :  { %v1481_v7 = vmul.f32 %v2298_v2, %v1480_v4  ;;  %2163 = vst.msk [vmem:[%s3129_s10 + $0x40] sm:$0xff] %vm227_vm4, %v1576_v10  ;;  %2171 = vmatmul.msk.f32.vlgmr.msra.gmra.mxu0 %vm227_vm4, %v1576_v10  ;;  %vm1539_vm15 = vweird.f32 %v2930_v1  ;;  %v1546_v53 = vor.u32 1.1754944e-38, %v1545_v33  ;;  %vm1553_vm2 = vweird.f32 %v2933_v5 }
 0x9d4   :  { %v1495_v57 = vmul.f32 %v2300_v17, %v1494_v6  ;;  %vm1544_vm6 = vcmp.eq.f32.partialorder %v1543_v32, 8.507059e+37  ;;  %vm1558_vm8 = vcmp.eq.f32.partialorder %v1557_v41, 8.507059e+37 }
 0x9d5   :  { %v1482_v12 = vadd.f32 %v2298_v2, %v1481_v7 }
 0x9d6   :  { %v1496_v40 = vadd.f32 %v2300_v17, %v1495_v57  ;;  %v2302_v61 = vpop.eup %2301 }
 0x9d7   :  { %v1486_v8 = vsel %vm2937_vm10, %v2298_v2, %v1482_v12  ;;  %v1535_v22 = vmul.f32 %v2302_v61, %v2930_v1  ;;  %v2949_v23 = vpop.xlane.xlu1 %1453  ;;  %vm1540_vm14 = vweird.f32 %v2302_v61 }
 0x9d8   :  { %v2304_v45 = vpop.eup %2303  ;;  %v1500_v16 = vsel %vm1499_vm11, %v2300_v17, %v1496_v40  ;;  %2305 = vrcp.f32 %v2949_v23  ;;  %v1491_v29 = vsel %vm1488_vm13, %v1490_v21, %v1486_v8  ;;  %vm1541_vm1 = vmor %vm1539_vm15, %vm1540_vm14  ;;  %v1529_v17 = vand.u32 2147483647, %v2949_v23 }
 0x9d9   :  { %v1549_v24 = vmul.f32 %v2304_v45, %v2933_v5  ;;  %v2953_v56 = vpop.xlane.xlu2 %1462  ;;  %v1505_v27 = vsel %vm1502_vm12, %v1504_v36, %v1500_v16  ;;  %v1536_v30 = vsub.f32 1.0, %v1535_v22  ;;  %vm1554_vm5 = vweird.f32 %v2304_v45 }
 0x9da   :  { %2307 = vrcp.f32 %v2953_v56  ;;  %v1578_v51 = vmul.f32 %v2893_v15, %v1505_v27  ;;  %v2962_v62 = vmul.f32 %v2891_v14, %v1491_v29  ;;  %vm1555_vm7 = vmor %vm1553_vm2, %vm1554_vm5  ;;  %v1560_v14 = vor.u32 1.1754944e-38, %v1559_v48  ;;  %v1776_v7 = vpop.permute.xlu0 %1775 }
 0x9db   :  { %v1550_v25 = vsub.f32 1.0, %v1549_v24  ;;  %v1537_v37 = vmul.f32 %v2302_v61, %v1536_v30  ;;  %v1531_v59 = vand.u32 2147483648, %v2949_v23  ;;  %vm1525_vm10 = vweird.f32 %v2949_v23 }
 0x9dc   :  { %2165 = vst.msk [vmem:[%s3129_s10 + $0x50] sm:$0xff] %vm227_vm4, %v1578_v51  ;;  %2173 = vmatmul.msk.f32.vlgmr.msra.gmra.mxu2 %vm227_vm4, %v1578_v51  ;;  %v1573_v6 = vand.u32 2147483648, %v2953_v56  ;;  %v1571_v9 = vand.u32 2147483647, %v2953_v56  ;;  %vm1567_vm13 = vweird.f32 %v2953_v56  ;;  %vm1530_vm14 = vcmp.eq.f32.partialorder %v1529_v17, 8.507059e+37 }
 0x9dd   :  { %v1551_v50 = vmul.f32 %v2304_v45, %v1550_v25  ;;  %v1538_v39 = vadd.f32 %v2302_v61, %v1537_v37  ;;  %2164 = vst.msk [vmem:[%s3129_s10 + $0x48] sm:$0xff] %vm227_vm4, %v2962_v62  ;;  %v3021_v25 = vld [vmem:[%s3123_s4 + $0x8] sm:$0xff] }
 0x9de   :  { %v2306_v52 = vpop.eup %2305  ;;  %v1574_v40 = vor.u32 1.1754944e-38, %v1573_v6  ;;  %vm1572_vm15 = vcmp.eq.f32.partialorder %v1571_v9, 8.507059e+37  ;;  %v2180_v6 = vld [vmem:[%s3124_s5 + $0x28] sm:$0xff] }
 0x9df   :  { %v1552_v54 = vadd.f32 %v2304_v45, %v1551_v50  ;;  %v1542_v15 = vsel %vm1541_vm1, %v2302_v61, %v1538_v39  ;;  %v1521_v63 = vmul.f32 %v2306_v52, %v2949_v23  ;;  %v1451_v55 = vpop.xlane.xlu1 %1450  ;;  %vm1526_vm9 = vweird.f32 %v2306_v52 }
 0x9e0   :  { %v2308_v31 = vpop.eup %2307  ;;  %v1547_v20 = vsel %vm1544_vm6, %v1546_v53, %v1542_v15  ;;  %2309 = vrcp.f32 %v1451_v55  ;;  %vm1527_vm12 = vmor %vm1525_vm10, %vm1526_vm9  ;;  %v1517_v16 = vand.u32 2147483648, %v1451_v55  ;;  %v1515_v21 = vand.u32 2147483647, %v1451_v55 }
 0x9e1   :  { %v1556_v58 = vsel %vm1555_vm7, %v2304_v45, %v1552_v54  ;;  %v2229_v18 = vpop.permute.xlu2 %2228  ;;  %v1522_v2 = vsub.f32 1.0, %v1521_v63  ;;  %v1563_v43 = vmul.f32 %v2308_v31, %v2953_v56  ;;  %v1581_v5 = vmul.f32 %v2899_v26, %v1547_v20 }
 0x9e2   :  { %v1561_v19 = vsel %vm1558_vm8, %v1560_v14, %v1556_v58  ;;  %v2231_v60 = vunpack.i.h.bf16 %v2229_v18  ;;  %v2230_v0 = vunpack.i.l.bf16 %v2229_v18  ;;  %vm1568_vm11 = vweird.f32 %v2308_v31  ;;  %v1724_v32 = vpop.permute.xlu0 %1723 }
 0x9e3   :  { %v1523_v1 = vmul.f32 %v2306_v52, %v1522_v2  ;;  %v1564_v3 = vsub.f32 1.0, %v1563_v43  ;;  %v1582_v4 = vmul.f32 %v2902_v28, %v1561_v19  ;;  %v1532_v26 = vor.u32 1.1754944e-38, %v1531_v59  ;;  %2168 = vst.msk [vmem:[%s3129_s10 + $0x68] sm:$0xff] %vm227_vm4, %v1581_v5  ;;  %vm1569_vm5 = vmor %vm1567_vm13, %vm1568_vm11 }
 0x9e4   :  { %1692 = vmatpush.msra.mxu3 %v2230_v0  ;;  %1770 = vmatpush.msrb.mxu2 %v2231_v60  ;;  %vm1511_vm2 = vweird.f32 %v1451_v55  ;;  %vm1516_vm7 = vcmp.eq.f32.partialorder %v1515_v21, 8.507059e+37 }
 0x9e5   :  { %v1524_v44 = vadd.f32 %v2306_v52, %v1523_v1  ;;  %v1565_v57 = vmul.f32 %v2308_v31, %v1564_v3  ;;  %2169 = vst.msk [vmem:[%s3129_s10 + $0x70] sm:$0xff] %vm227_vm4, %v1582_v4  ;;  %2177 = vmatmul.msk.f32.vlgmr.msrb.gmra.mxu2 %vm227_vm4, %v1582_v4 }
 0x9e6   :  { %1796 = vmatpush.msrb.mxu3 %v1776_v7  ;;  %v2310_v28 = vpop.eup %2309  ;;  %v2179_v7 = vld [vmem:[%s3124_s5 + $0x20] sm:$0xff] }
 0x9e7   :  { %v1528_v10 = vsel %vm1527_vm12, %v2306_v52, %v1524_v44  ;;  %v1566_v11 = vadd.f32 %v2308_v31, %v1565_v57  ;;  %v1507_v12 = vmul.f32 %v2310_v28, %v1451_v55  ;;  %vm1512_vm1 = vweird.f32 %v2310_v28 }
 0x9e8   :  { %v1533_v49 = vsel %vm1530_vm14, %v1532_v26, %v1528_v10  ;;  %vm1513_vm6 = vmor %vm1511_vm2, %vm1512_vm1  ;;  %v2191_v26 = vld [vmem:[%s3125_s6 + $0x70] sm:$0xff]  ;;  %v2190_v10 = vld [vmem:[%s3125_s6 + $0x68] sm:$0xff] }
 0x9e9   :  { %v1570_v47 = vsel %vm1569_vm5, %v2308_v31, %v1566_v11  ;;  %v1508_v61 = vsub.f32 1.0, %v1507_v12  ;;  %v1580_v8 = vmul.f32 %v2908_v34, %v1533_v49  ;;  %v1518_v34 = vor.u32 1.1754944e-38, %v1517_v16  ;;  %v2189_v49 = vld [vmem:[%s3125_s6 + $0x60] sm:$0xff] }
 0x9ea   :  { %v1575_v45 = vsel %vm1572_vm15, %v1574_v40, %v1570_v47 }
 0x9eb   :  { %v1509_v36 = vmul.f32 %v2310_v28, %v1508_v61  ;;  %2167 = vst.msk [vmem:[%s3129_s10 + $0x60] sm:$0xff] %vm227_vm4, %v1580_v8  ;;  %v1583_v22 = vmul.f32 %v2912_v35, %v1575_v45  ;;  %v2188_v61 = vld [vmem:[%s3125_s6 + $0x58] sm:$0xff] }
 0x9ed   :  { %v1510_v23 = vadd.f32 %v2310_v28, %v1509_v36  ;;  %2170 = vst.msk [vmem:[%s3129_s10 + $0x78] sm:$0xff] %vm227_vm4, %v1583_v22 }
 0x9ef   :  { %v1514_v24 = vsel %vm1513_vm6, %v2310_v28, %v1510_v23  ;;  %v2192_v28 = vld [vmem:[%s3125_s6 + $0x78] sm:$0xff] }
 0x9f0   :  { %v1519_v56 = vsel %vm1516_vm7, %v1518_v34, %v1514_v24  ;;  %v1856_v34 = vperm.slane %v3021_v25, 1 }
 0x9f1   :  { %v1579_v27 = vmul.f32 %v2918_v38, %v1519_v56 }
 0x9f3   :  { %2166 = vst.msk [vmem:[%s3129_s10 + $0x58] sm:$0xff] %vm227_vm4, %v1579_v27  ;;  %2174 = vmatmul.msk.f32.vlgmr.msra.gmra.mxu3 %vm227_vm4, %v1579_v27 }
 0x9f7   :  { %v2234_v35 = vpop.permute.xlu1 %2233 }
 0x9f8   :  { %v2236_v29 = vunpack.i.h.bf16 %v2234_v35  ;;  %v2235_v30 = vunpack.i.l.bf16 %v2234_v35  ;;  %v1859_v35 = vperm.slane %v3021_v25, 2 }
 0x9fa   :  { %1640 = vmatpush.msrb.mxu1 %v2235_v30  ;;  %1718 = vmatpush.msrb.mxu0 %v2236_v29 }
 0x9fb   :  { %2172 = vmatmul.msk.f32.vlgmr.msrb.gmra.mxu1 %vm227_vm4, %v2962_v62  ;;  %2175 = vmatmul.msk.f32.vlgmr.msrb.gmra.mxu0 %vm227_vm4, %v1580_v8  ;;  %v1807_v62 = vperm.slane %v3021_v25, 0 }
 0x9fc   :  { %1744 = vmatpush.msra.mxu1 %v1724_v32  ;;  %2178 = vmatmul.msk.f32.vlgmr.msrb.gmra.mxu3 %vm227_vm4, %v1583_v22 }
 0x9fe   :  { %1923 = vmatpush.msrb.mxu1 %v2192_v28 }
 0xa00   :  { %1924 = vmatpush.msrb.mxu1 %v2191_v26 }
 0xa02   :  { %1925 = vmatpush.msrb.mxu1 %v2190_v10 }
 0xa03   :  { %2176 = vmatmul.msk.f32.vlgmr.msra.gmra.mxu1 %vm227_vm4, %v1581_v5  ;;  %v2181_v5 = vld [vmem:[%s3124_s5 + $0x30] sm:$0xff] }
 0xa04   :  { %1926 = vmatpush.msrb.mxu1 %v2189_v49 }
 0xa06   :  { %1927 = vmatpush.msrb.mxu1 %v2188_v61 }
 0xa50   :  { %v1616_v38 = vpop.f32.mrf.mxu0 }
 0xa5f   :  { %v1668_v33 = vpop.f32.mrf.mxu2 }
 0xa60   :  { %v1801_v37 = vadd.f32 %v1668_v33, %v1616_v38 }
 0xa68   :  { %v1772_v39 = vpop.f32.mrf.mxu2 }
 0xa76   :  { %v1694_v41 = vpop.f32.mrf.mxu3 }
 0xa78   :  { %v1642_v48 = vpop.f32.mrf.mxu1  ;;  %v1720_v50 = vpop.f32.mrf.mxu0 }
 0xa79   :  { %v1803_v51 = vadd.f32 %v1801_v37, %v1720_v50  ;;  %v1802_v54 = vadd.f32 %v1694_v41, %v1642_v48 }
 0xa7b   :  { %v1805_v52 = vadd.f32 %v1803_v51, %v1772_v39  ;;  %v2187_v51 = vld [vmem:[%s3125_s6 + $0x50] sm:$0xff]  ;;  %v2185_v39 = vld [vmem:[%s3125_s6 + $0x40] sm:$0xff] }
 0xa7c   :  { %1928 = vmatpush.msrb.mxu1 %v2187_v51 }
 0xa7d   :  { %v1808_v53 = vadd.f32 %v1807_v62, %v1805_v52  ;;  %v1867_v52 = vperm.slane %v3021_v25, 3 }
 0xa7f   :  { %v1810_v15 = vadd.f32 %v1808_v53, %v2780_v13  ;;  %v1798_v31 = vpop.f32.mrf.mxu3 }
 0xa80   :  { %v1746_v14 = vpop.f32.mrf.mxu1 }
 0xa81   :  { %v1804_v63 = vadd.f32 %v1802_v54, %v1746_v14  ;;  %v1812_v55 = vsel %vm125_vm3, %v1810_v15, 0.0 }
 0xa82   :  { %1813 = vadd.xlane.f32.xlu2 %v1812_v55 }
 0xa83   :  { %v1806_v20 = vadd.f32 %v1804_v63, %v1798_v31  ;;  %v1908_v31 = vperm.slane %v3021_v25, 4 }
 0xa85   :  { %v1809_v58 = vadd.f32 %v1807_v62, %v1806_v20  ;;  %v2186_v62 = vld [vmem:[%s3125_s6 + $0x48] sm:$0xff] }
 0xa86   :  { %1929 = vmatpush.msrb.mxu1 %v2186_v62 }
 0xa87   :  { %v1811_v18 = vadd.f32 %v1809_v58, %v2789_v46  ;;  %v2182_v46 = vld [vmem:[%s3124_s5 + $0x38] sm:$0xff] }
 0xa88   :  { %1886 = vmatpush.msra.mxu0 %v2182_v46  ;;  %1930 = vmatpush.msrb.mxu1 %v2185_v39 }
 0xa89   :  { %v1815_v19 = vsel %vm125_vm3, %v1811_v18, 0.0 }
 0xa8a   :  { %1816 = vadd.xlane.f32.xlu1 %v1815_v19  ;;  %1887 = vmatpush.msra.mxu0 %v2181_v5 }
 0xa8c   :  { %1888 = vmatpush.msra.mxu0 %v2180_v6 }
 0xa8e   :  { %1889 = vmatpush.msra.mxu0 %v2179_v7 }
 0xaf5   :  { %v1814_v2 = vpop.xlane.xlu2 %1813 }
 0xaf6   :  { %v1818_v17 = vmul.f32 %v1814_v2, %v2709_v42 }
 0xaf8   :  { %v1820_v43 = vsub.f32 %v1810_v15, %v1818_v17 }
 0xafa   :  { %v1822_v59 = vmul.f32 %v1820_v43, %v1820_v43 }
 0xafc   :  { %v1824_v13 = vsel %vm125_vm3, %v1822_v59, 0.0 }
 0xafd   :  { %1825 = vadd.xlane.f32.xlu0 %v1824_v13  ;;  %v1817_v60 = vpop.xlane.xlu1 %1816 }
 0xafe   :  { %v1819_v0 = vmul.f32 %v1817_v60, %v2709_v42 }
 0xb00   :  { %v1821_v1 = vsub.f32 %v1811_v18, %v1819_v0 }
 0xb02   :  { %v1823_v3 = vmul.f32 %v1821_v1, %v1821_v1 }
 0xb04   :  { %v1827_v4 = vsel %vm125_vm3, %v1823_v3, 0.0 }
 0xb05   :  { %1828 = vadd.xlane.f32.xlu2 %v1827_v4 }
 0xb70   :  { %v1826_v44 = vpop.xlane.xlu0 %1825 }
 0xb71   :  { %v1830_v57 = vmul.f32 %v1826_v44, %v2709_v42 }
 0xb73   :  { %v1832_v9 = vadd.f32 1e-05, %v1830_v57 }
 0xb75   :  { %2311 = vrsqrt.f32 %v1832_v9  ;;  %vm1840_vm8 = vweird.f32 %v1832_v9 }
 0xb78   :  { %v1829_v11 = vpop.xlane.xlu2 %1828 }
 0xb79   :  { %v1831_v12 = vmul.f32 %v1829_v11, %v2709_v42 }
 0xb7b   :  { %v2312_v40 = vpop.eup %2311  ;;  %v1833_v47 = vadd.f32 1e-05, %v1831_v12 }
 0xb7c   :  { %v1835_v8 = vmul.f32 %v2312_v40, %v1832_v9  ;;  %vm1841_vm4 = vweird.f32 %v2312_v40 }
 0xb7d   :  { %2313 = vrsqrt.f32 %v1833_v47  ;;  %vm1842_vm9 = vmor %vm1840_vm8, %vm1841_vm4  ;;  %vm1850_vm11 = vweird.f32 %v1833_v47 }
 0xb7e   :  { %v1836_v45 = vmul.f32 %v2312_v40, %v1835_v8 }
 0xb80   :  { %v1837_v16 = vmul.f32 0.5, %v1836_v45 }
 0xb82   :  { %v1838_v36 = vsub.f32 1.5, %v1837_v16  ;;  %v1984_v16 = vperm.slane %v3021_v25, 5 }
 0xb83   :  { %v2314_v21 = vpop.eup %2313 }
 0xb84   :  { %v1839_v22 = vmul.f32 %v2312_v40, %v1838_v36  ;;  %v1845_v23 = vmul.f32 %v2314_v21, %v1833_v47  ;;  %vm1851_vm10 = vweird.f32 %v2314_v21 }
 0xb85   :  { %vm1852_vm12 = vmor %vm1850_vm11, %vm1851_vm10 }
 0xb86   :  { %v1843_v24 = vsel %vm1842_vm9, %v2312_v40, %v1839_v22  ;;  %v1846_v56 = vmul.f32 %v2314_v21, %v1845_v23  ;;  %v1987_v23 = vperm.slane %v3021_v25, 6 }
 0xb87   :  { %v1854_v27 = vmul.f32 %v1843_v24, %v1820_v43 }
 0xb88   :  { %v1847_v29 = vmul.f32 0.5, %v1846_v56 }
 0xb89   :  { %v1857_v30 = vmul.f32 %v1856_v34, %v1854_v27 }
 0xb8a   :  { %v1848_v32 = vsub.f32 1.5, %v1847_v29 }
 0xb8b   :  { %v1860_v38 = vadd.f32 %v1859_v35, %v1857_v30 }
 0xb8c   :  { %v1849_v33 = vmul.f32 %v2314_v21, %v1848_v32 }
 0xb8d   :  { %2183 = vmatmul.msk.f32.vlgmr.msra.gmra.mxu0 %vm125_vm3, %v1860_v38 }
 0xb8e   :  { %v1853_v37 = vsel %vm1852_vm12, %v2314_v21, %v1849_v33 }
 0xb8f   :  { %v1855_v41 = vmul.f32 %v1853_v37, %v1821_v1 }
 0xb91   :  { %v1858_v48 = vmul.f32 %v1856_v34, %v1855_v41 }
 0xb93   :  { %v1861_v50 = vadd.f32 %v1859_v35, %v1858_v48 }
 0xb95   :  { %2184 = vmatmul.msk.f32.gmra.mxu0 %vm125_vm3, %v1861_v50 }
 0xc0a   :  { %v1891_v53 = vpop.f32.mrf.mxu0 }
 0xc0b   :  { %v1892_v54 = vadd.f32 %v1891_v53, %v1867_v52 }
 0xc0d   :  { %v1897_v15 = vmax.f32 %v1892_v54, 0.0 }
 0xc0f   :  { %2193 = vmatmul.msk.f32.vlgmr.msrb.gmra.mxu1 %vm78_vm0, %v1897_v15  ;;  %v2044_v15 = vld [vmem:[%s3127_s8 + $0x18] sm:$0xff] }
 0xc10   :  { %2064 = vmatpush.msra.mxu2 %v2044_v15 }
 0xc12   :  { %v1894_v14 = vpop.f32.mrf.mxu0 }
 0xc13   :  { %v1895_v63 = vadd.f32 %v1894_v14, %v1867_v52  ;;  %v2043_v14 = vld [vmem:[%s3127_s8 + $0x10] sm:$0xff] }
 0xc14   :  { %2065 = vmatpush.msra.mxu2 %v2043_v14 }
 0xc15   :  { %v1898_v55 = vmax.f32 %v1895_v63, 0.0  ;;  %v2042_v63 = vld [vmem:[%s3127_s8 + $0x8] sm:$0xff] }
 0xc16   :  { %2066 = vmatpush.msra.mxu2 %v2042_v63 }
 0xc17   :  { %2194 = vmatmul.msk.f32.gmra.mxu1 %vm78_vm0, %v1898_v55  ;;  %v2041_v55 = vld [vmem:[%s3127_s8] sm:$0xff] }
 0xc18   :  { %2067 = vmatpush.msra.mxu2 %v2041_v55 }
 0xc8c   :  { %v1932_v20 = vpop.f32.mrf.mxu1 }
 0xc8d   :  { %v1933_v58 = vadd.f32 %v1932_v20, %v1908_v31 }
 0xc8f   :  { %v1938_v18 = vadd.f32 %v1933_v58, %v1860_v38 }
 0xc91   :  { %v1940_v19 = vsel %vm125_vm3, %v1938_v18, 0.0 }
 0xc92   :  { %1941 = vadd.xlane.f32.xlu1 %v1940_v19 }
 0xc94   :  { %v1935_v2 = vpop.f32.mrf.mxu1 }
 0xc95   :  { %v1936_v17 = vadd.f32 %v1935_v2, %v1908_v31 }
 0xc97   :  { %v1939_v43 = vadd.f32 %v1936_v17, %v1861_v50 }
 0xc99   :  { %v1943_v59 = vsel %vm125_vm3, %v1939_v43, 0.0 }
 0xc9a   :  { %1944 = vadd.xlane.f32.xlu0 %v1943_v59 }
 0xd05   :  { %v1942_v13 = vpop.xlane.xlu1 %1941 }
 0xd06   :  { %v1946_v60 = vmul.f32 %v1942_v13, %v2709_v42 }
 0xd08   :  { %v1948_v0 = vsub.f32 %v1938_v18, %v1946_v60  ;;  %v1990_v60 = vld [vmem:[%s3126_s7] sm:$0xff]  ;;  %s2383_s7 = smov [#allocation5]  }
 0xd09   :  { %s2081_s8 = sshll.u32 %s2383_s7, 4  ;;  %s2082_s8 = int_to_ptr.vmem [resolvable:$true] %s2081_s8 }
 0xd0a   :  { %v1950_v1 = vmul.f32 %v1948_v0, %v1948_v0 }
 0xd0c   :  { %v1952_v3 = vsel %vm125_vm3, %v1950_v1, 0.0 }
 0xd0d   :  { %v1945_v4 = vpop.xlane.xlu0 %1944  ;;  %1953 = vadd.xlane.f32.xlu2 %v1952_v3 }
 0xd0e   :  { %v1947_v46 = vmul.f32 %v1945_v4, %v2709_v42 }
 0xd10   :  { %v1949_v5 = vsub.f32 %v1939_v43, %v1947_v46  ;;  %v2035_v46 = vperm.slane %v1990_v60, 0 }
 0xd12   :  { %v1951_v6 = vmul.f32 %v1949_v5, %v1949_v5 }
 0xd14   :  { %v1955_v7 = vsel %vm125_vm3, %v1951_v6, 0.0 }
 0xd15   :  { %1956 = vadd.xlane.f32.xlu1 %v1955_v7  ;;  %v2038_v7 = vperm.slane %v1990_v60, 1 }
 0xd80   :  { %v1954_v44 = vpop.xlane.xlu2 %1953 }
 0xd81   :  { %v1958_v57 = vmul.f32 %v1954_v44, %v2709_v42 }
 0xd83   :  { %v1960_v9 = vadd.f32 1e-05, %v1958_v57 }
 0xd85   :  { %2315 = vrsqrt.f32 %v1960_v9  ;;  %vm1968_vm13 = vweird.f32 %v1960_v9 }
 0xd88   :  { %v1957_v28 = vpop.xlane.xlu1 %1956 }
 0xd89   :  { %v1959_v26 = vmul.f32 %v1957_v28, %v2709_v42 }
 0xd8b   :  { %v2316_v10 = vpop.eup %2315  ;;  %v1961_v11 = vadd.f32 1e-05, %v1959_v26 }
 0xd8c   :  { %v1963_v12 = vmul.f32 %v2316_v10, %v1960_v9  ;;  %vm1969_vm0 = vweird.f32 %v2316_v10 }
 0xd8d   :  { %2317 = vrsqrt.f32 %v1961_v11  ;;  %vm1970_vm14 = vmor %vm1968_vm13, %vm1969_vm0  ;;  %vm1978_vm15 = vweird.f32 %v1961_v11 }
 0xd8e   :  { %v1964_v49 = vmul.f32 %v2316_v10, %v1963_v12 }
 0xd90   :  { %v1965_v40 = vmul.f32 0.5, %v1964_v49 }
 0xd92   :  { %v1966_v47 = vsub.f32 1.5, %v1965_v40  ;;  %v2045_v40 = vperm.slane %v1990_v60, 2 }
 0xd93   :  { %v2318_v61 = vpop.eup %2317 }
 0xd94   :  { %v1967_v8 = vmul.f32 %v2316_v10, %v1966_v47  ;;  %v1973_v45 = vmul.f32 %v2318_v61, %v1961_v11  ;;  %vm1979_vm5 = vweird.f32 %v2318_v61 }
 0xd95   :  { %vm1980_vm1 = vmor %vm1978_vm15, %vm1979_vm5 }
 0xd96   :  { %v1974_v36 = vmul.f32 %v2318_v61, %v1973_v45  ;;  %v1971_v21 = vsel %vm1970_vm14, %v2316_v10, %v1967_v8 }
 0xd97   :  { %v1982_v22 = vmul.f32 %v1971_v21, %v1948_v0 }
 0xd98   :  { %v1975_v34 = vmul.f32 0.5, %v1974_v36 }
 0xd99   :  { %v1985_v24 = vmul.f32 %v1984_v16, %v1982_v22 }
 0xd9a   :  { %v1976_v56 = vsub.f32 1.5, %v1975_v34 }
 0xd9b   :  { %v1988_v27 = vadd.f32 %v1987_v23, %v1985_v24 }
 0xd9c   :  { %v1977_v35 = vmul.f32 %v2318_v61, %v1976_v56 }
 0xd9d   :  { %v1991_v29 = vsel %vm125_vm3, %v1988_v27, 0.0 }
 0xd9e   :  { %1992 = vadd.xlane.f32.xlu0 %v1991_v29  ;;  %v1981_v30 = vsel %vm1980_vm1, %v2318_v61, %v1977_v35 }
 0xd9f   :  { %v1983_v32 = vmul.f32 %v1981_v30, %v1949_v5 }
 0xda1   :  { %v1986_v38 = vmul.f32 %v1984_v16, %v1983_v32 }
 0xda3   :  { %v1989_v33 = vadd.f32 %v1987_v23, %v1986_v38 }
 0xda5   :  { %v1994_v37 = vsel %vm125_vm3, %v1989_v33, 0.0 }
 0xda6   :  { %1995 = vadd.xlane.f32.xlu2 %v1994_v37 }
 0xe11   :  { %v1993_v41 = vpop.xlane.xlu0 %1992 }
 0xe12   :  { %v1997_v25 = vmul.f32 %v1993_v41, %v2709_v42 }
 0xe14   :  { %v1999_v48 = vsub.f32 %v1988_v27, %v1997_v25 }
 0xe16   :  { %v2001_v50 = vmul.f32 %v1999_v48, %v1999_v48 }
 0xe18   :  { %v2003_v51 = vsel %vm125_vm3, %v2001_v50, 0.0 }
 0xe19   :  { %2004 = vadd.xlane.f32.xlu1 %v2003_v51  ;;  %v1996_v62 = vpop.xlane.xlu2 %1995 }
 0xe1a   :  { %v1998_v39 = vmul.f32 %v1996_v62, %v2709_v42 }
 0xe1c   :  { %v2000_v52 = vsub.f32 %v1989_v33, %v1998_v39 }
 0xe1e   :  { %v2002_v53 = vmul.f32 %v2000_v52, %v2000_v52 }
 0xe20   :  { %v2006_v54 = vsel %vm125_vm3, %v2002_v53, 0.0 }
 0xe21   :  { %2007 = vadd.xlane.f32.xlu0 %v2006_v54 }
 0xe8c   :  { %v2005_v31 = vpop.xlane.xlu1 %2004 }
 0xe8d   :  { %v2009_v20 = vmul.f32 %v2005_v31, %v2709_v42 }
 0xe8f   :  { %v2011_v58 = vadd.f32 1e-05, %v2009_v20 }
 0xe91   :  { %2319 = vrsqrt.f32 %v2011_v58  ;;  %vm2019_vm6 = vweird.f32 %v2011_v58 }
 0xe94   :  { %v2008_v18 = vpop.xlane.xlu0 %2007 }
 0xe95   :  { %v2010_v19 = vmul.f32 %v2008_v18, %v2709_v42 }
 0xe97   :  { %v2320_v2 = vpop.eup %2319  ;;  %v2012_v17 = vadd.f32 1e-05, %v2010_v19 }
 0xe98   :  { %v2014_v43 = vmul.f32 %v2320_v2, %v2011_v58  ;;  %vm2020_vm2 = vweird.f32 %v2320_v2 }
 0xe99   :  { %2321 = vrsqrt.f32 %v2012_v17  ;;  %vm2021_vm7 = vmor %vm2019_vm6, %vm2020_vm2  ;;  %vm2029_vm8 = vweird.f32 %v2012_v17 }
 0xe9a   :  { %v2015_v59 = vmul.f32 %v2320_v2, %v2014_v43 }
 0xe9c   :  { %v2016_v13 = vmul.f32 0.5, %v2015_v59 }
 0xe9e   :  { %v2017_v0 = vsub.f32 1.5, %v2016_v13 }
 0xe9f   :  { %v2322_v1 = vpop.eup %2321 }
 0xea0   :  { %v2018_v3 = vmul.f32 %v2320_v2, %v2017_v0  ;;  %v2024_v4 = vmul.f32 %v2322_v1, %v2012_v17  ;;  %vm2030_vm4 = vweird.f32 %v2322_v1 }
 0xea1   :  { %vm2031_vm9 = vmor %vm2029_vm8, %vm2030_vm4 }
 0xea2   :  { %v2022_v5 = vsel %vm2021_vm7, %v2320_v2, %v2018_v3  ;;  %v2025_v42 = vmul.f32 %v2322_v1, %v2024_v4 }
 0xea3   :  { %v2033_v6 = vmul.f32 %v2022_v5, %v1999_v48 }
 0xea4   :  { %v2026_v44 = vmul.f32 0.5, %v2025_v42 }
 0xea5   :  { %v2036_v57 = vmul.f32 %v2035_v46, %v2033_v6 }
 0xea6   :  { %v2027_v9 = vsub.f32 1.5, %v2026_v44 }
 0xea7   :  { %v2039_v28 = vadd.f32 %v2038_v7, %v2036_v57 }
 0xea8   :  { %v2028_v26 = vmul.f32 %v2322_v1, %v2027_v9 }
 0xea9   :  { %2195 = vmatmul.msk.f32.vlgmr.msra.gmra.mxu2 %vm125_vm3, %v2039_v28 }
 0xeaa   :  { %v2032_v10 = vsel %vm2031_vm9, %v2322_v1, %v2028_v26 }
 0xeab   :  { %v2034_v11 = vmul.f32 %v2032_v10, %v2000_v52 }
 0xead   :  { %v2037_v12 = vmul.f32 %v2035_v46, %v2034_v11 }
 0xeaf   :  { %v2040_v49 = vadd.f32 %v2038_v7, %v2037_v12 }
 0xeb1   :  { %2196 = vmatmul.msk.f32.gmra.mxu2 %vm125_vm3, %v2040_v49 }
 0xf2c   :  { %v2069_v47 = vpop.f32.mrf.mxu2 }
 0xf2d   :  { %v2070_v61 = vadd.f32 %v2069_v47, %v2045_v40 }
 0xf2f   :  { %2075 = vst [vmem:[#allocation5] sm:$0xff] %v2070_v61 }
 0xf34   :  { %v2072_v8 = vpop.f32.mrf.mxu2 }
 0xf35   :  { %v2073_v45 = vadd.f32 %v2072_v8, %v2045_v40 }
 0xf37   :  { %2076 = vst [vmem:[#allocation5 + $0x8] sm:$0xff] %v2073_v45 }
 0xf38   :  { %2089 = dma.vmem_to_hbm [thread:$0]  %s2082_s8, 256, %s2084_s27, [#allocation4], %s2376_s18, %s2376_s18, %s2377_s19  }
 0xf39   :  { %2373 = dma.done.wait [#allocation4], 256  }
 0xf3a   :  { %2374 = vsyncadd [#allocation4], 4294967040 }
 0xf3b   :  { %2098 = vsyncpa [#allocation3], 1 }
 0xf3c   :  { %2099 = vsyncpa [#allocation4], 1 }

</bundles_post_ra>
